<compile_context>
chip_gen: v5e
topology: v5e:2x2
jax: 0.10.0
libtpu: 0.0.40
codegen_flags: <defaults>
</compile_context>

<pallas_src>
import functools
import math

import jax
import jax.numpy as jnp
from jax.experimental import pallas as pl
from jax.experimental.pallas import tpu as pltpu


# ---------------------------------------------------------------------------
# Kernel
# ---------------------------------------------------------------------------
def _layer_norm(h, gamma, beta, n_features, eps=1e-6):
    """GraFormer LayerNorm: a * (x - mean) / (std_unbiased + eps) + b."""
    mean = jnp.mean(h, axis=-1, keepdims=True)
    centered = h - mean
    var = jnp.sum(centered * centered, axis=-1, keepdims=True) * (1.0 / (n_features - 1))
    std = jnp.sqrt(var)
    inv = pl.reciprocal(std + eps, approx=True)          # EUP; frees VALU divide slots
    return gamma * (centered * inv) + beta


def gra_atten_kernel(x_ref, c_ref, mask_bias_ref,
                     ln0a_ref, ln0b_ref, ln1a_ref, ln1b_ref,
                     wada_ref, bada_ref,
                     wqkv_ref, bqkv_ref, wo_ref, bo_ref,
                     lblk_ref, wg1_ref, bg1_ref, wg2_ref, bg2_ref,
                     o_ref,
                     attn_scratch,
                     *, num_heads):
    TB, N, D = x_ref.shape
    H = num_heads
    dk = D // H
    M = TB * N
    f32 = jnp.float32
    bf16 = jnp.bfloat16

    # Fold the batch tile into rows: (TB, N, D) -> (TB*N, D) is layout-free.
    x = x_ref[...].reshape(M, D).astype(f32)
    c = c_ref[...].reshape(M, D).astype(f32)

    # ---- adaLN: SiLU(c), then both sublayers' (shift,scale,gate) in ONE (D,6D) matmul ----
    sig = pl.reciprocal(1.0 + jnp.exp(-c), approx=True)       # sigmoid via EUP exp + rcp
    sc = c * sig                                              # SiLU(c)
    ada = jnp.dot(sc.astype(bf16), wada_ref[...],
                  preferred_element_type=f32) + bada_ref[...]
    shift0, scale0, gate0 = ada[:, 0:D], ada[:, D:2 * D], ada[:, 2 * D:3 * D]
    shift1, scale1, gate1 = ada[:, 3 * D:4 * D], ada[:, 4 * D:5 * D], ada[:, 5 * D:6 * D]

    # ---- sublayer 0: adaLN-modulated multi-head self-attention ----
    xm = _layer_norm(x, ln0a_ref[...], ln0b_ref[...], D) * (1.0 + scale0) + shift0
    qkv = jnp.dot(xm.astype(bf16), wqkv_ref[...],
                  preferred_element_type=f32) + bqkv_ref[...]             # (M, 3D)

    mask_bias = mask_bias_ref[...]       # (M, M) additive bias: mask + block-diag (no cross-batch)
    inv_sqrt_dk = 1.0 / math.sqrt(dk)
    nt_dims = (((1,), (1,)), ((), ()))   # q @ k.T without materializing a transpose

    for h in range(H):                   # static, small; each head = 2 full-M-row matmuls
        q = qkv[:, h * dk:(h + 1) * dk].astype(bf16)
        k = qkv[:, D + h * dk:D + (h + 1) * dk].astype(bf16)
        v = qkv[:, 2 * D + h * dk:2 * D + (h + 1) * dk].astype(bf16)
        s = jax.lax.dot_general(q, k, nt_dims, preferred_element_type=f32)
        s = s * inv_sqrt_dk + mask_bias
        s = s - jnp.max(s, axis=-1, keepdims=True)
        p = jnp.exp(s)
        p = p * pl.reciprocal(jnp.sum(p, axis=-1, keepdims=True), approx=True)
        attn_scratch[:, h * dk:(h + 1) * dk] = jnp.dot(
            p.astype(bf16), v, preferred_element_type=f32)

    attn = jnp.dot(attn_scratch[...].astype(bf16), wo_ref[...],
                   preferred_element_type=f32) + bo_ref[...]
    x1 = x + gate0 * attn

    # ---- sublayer 1: adaLN-modulated GraphNet (two LAM_Gconv sharing L) ----
    xm1 = _layer_norm(x1, ln1a_ref[...], ln1b_ref[...], D) * (1.0 + scale1) + shift1

    lblk = lblk_ref[...]                 # (M, M) bf16 block-diagonal normalized Laplacian
    g = jnp.dot(lblk, xm1.astype(bf16), preferred_element_type=f32)
    g = jnp.dot(g.astype(bf16), wg1_ref[...], preferred_element_type=f32) + bg1_ref[...]
    g = jnp.maximum(g, 0.0)                                               # gconv1: ReLU
    g = jnp.dot(lblk, g.astype(bf16), preferred_element_type=f32)
    g = jnp.dot(g.astype(bf16), wg2_ref[...], preferred_element_type=f32) + bg2_ref[...]

    out = x1 + gate1 * g
    o_ref[...] = out.reshape(TB, N, D).astype(o_ref.dtype)


# ---------------------------------------------------------------------------
# Wrapper
# ---------------------------------------------------------------------------
def _pick_batch_tile(B, N, target_rows):
    """Smallest divisor of B with TB*N >= target_rows, preferring one that leaves
    >= 2 grid steps (v7x megacore). If no divisor reaches the target, fold all of B."""
    divisors = [d for d in range(1, B + 1) if B % d == 0]
    cands = [d for d in divisors if d * N >= target_rows]
    if not cands:
        return B
    two_step = [d for d in cands if B // d >= 2]
    return min(two_step) if two_step else min(cands)


def gra_atten_layer(x, mask, c, params, *, num_heads, batch_tile=None, target_rows=256):
    """x, c: (B, N, D); mask: (N, N) shared 0/1 attention mask -> (B, N, D)."""
    B, N, D = x.shape
    assert D % num_heads == 0
    if batch_tile is None:
        batch_tile = _pick_batch_tile(B, N, target_rows)
    assert B % batch_tile == 0
    TB = batch_tile
    M = TB * N
    grid = (B // TB,)

    f32 = jnp.float32
    bf16 = jnp.bfloat16

    # Host-side weight fusion (pure concatenation) + bf16 cast of MXU operands.
    w_ada = jnp.concatenate([params["w_ada0"], params["w_ada1"]], axis=1).astype(bf16)
    b_ada = jnp.concatenate([params["b_ada0"], params["b_ada1"]],
                            axis=0).reshape(1, 6 * D).astype(f32)
    w_qkv = jnp.concatenate([params["w_q"], params["w_k"], params["w_v"]], axis=1).astype(bf16)
    b_qkv = jnp.concatenate([params["b_q"], params["b_k"], params["b_v"]],
                            axis=0).reshape(1, 3 * D).astype(f32)
    w_o = params["w_o"].astype(bf16)
    w_g1 = params["w_g1"].astype(bf16)
    w_g2 = params["w_g2"].astype(bf16)

    # Host-side block-diagonal additive attention-mask bias (M, M), f32:
    # in-block entries follow masked_fill(mask==0, -1e9); cross-batch entries are -1e9.
    within = jnp.where(mask > 0, 0.0, -1e9).astype(f32)                       # (N, N)
    block_ind = jnp.kron(jnp.eye(TB, dtype=f32), jnp.ones((N, N), f32))       # (M, M)
    mask_bias = jnp.where(block_ind > 0, jnp.tile(within, (TB, TB)), -1e9).astype(f32)

    # Host-side block-diagonal normalized Laplacian kron(I_TB, d A d), bf16 for the MXU.
    A = params["adj"].astype(f32)
    d_hat = (jnp.sum(A, axis=0) + 1e-5) ** (-0.5)
    L = (d_hat[:, None] * A) * d_hat[None, :]
    l_block = jnp.kron(jnp.eye(TB, dtype=f32), L).astype(bf16)

    def r2(v):  # 1-D parameter -> (1, F) 2-D block, kept f32 (added to f32 accumulators)
        return v.reshape(1, -1).astype(f32)

    in_specs = [
        pl.BlockSpec((TB, N, D), lambda i: (i, 0, 0)),    # x
        pl.BlockSpec((TB, N, D), lambda i: (i, 0, 0)),    # c
        pl.BlockSpec((M, M), lambda i: (0, 0)),           # block-diag mask bias (shared)
        pl.BlockSpec((1, D), lambda i: (0, 0)),           # ln0 gamma
        pl.BlockSpec((1, D), lambda i: (0, 0)),           # ln0 beta
        pl.BlockSpec((1, D), lambda i: (0, 0)),           # ln1 gamma
        pl.BlockSpec((1, D), lambda i: (0, 0)),           # ln1 beta
        pl.BlockSpec((D, 6 * D), lambda i: (0, 0)),       # fused adaLN weight (bf16)
        pl.BlockSpec((1, 6 * D), lambda i: (0, 0)),       # fused adaLN bias
        pl.BlockSpec((D, 3 * D), lambda i: (0, 0)),       # fused QKV weight (bf16)
        pl.BlockSpec((1, 3 * D), lambda i: (0, 0)),       # fused QKV bias
        pl.BlockSpec((D, D), lambda i: (0, 0)),           # attention output proj W (bf16)
        pl.BlockSpec((1, D), lambda i: (0, 0)),           # attention output proj b
        pl.BlockSpec((M, M), lambda i: (0, 0)),           # block-diag Laplacian (bf16)
        pl.BlockSpec((D, 2 * D), lambda i: (0, 0)),       # gconv1 W (bf16)
        pl.BlockSpec((1, 2 * D), lambda i: (0, 0)),       # gconv1 b
        pl.BlockSpec((2 * D, D), lambda i: (0, 0)),       # gconv2 W (bf16)
        pl.BlockSpec((1, D), lambda i: (0, 0)),           # gconv2 b
    ]
    out_spec = pl.BlockSpec((TB, N, D), lambda i: (i, 0, 0))

    kernel = functools.partial(gra_atten_kernel, num_heads=num_heads)
    return pl.pallas_call(
        kernel,
        out_shape=jax.ShapeDtypeStruct((B, N, D), x.dtype),
        grid_spec=pltpu.PrefetchScalarGridSpec(
            num_scalar_prefetch=0,
            grid=grid,
            in_specs=in_specs,
            out_specs=out_spec,
            scratch_shapes=[pltpu.VMEM((M, D), jnp.float32)],   # per-head attention writeback
        ),
        compiler_params=pltpu.CompilerParams(
            dimension_semantics=("parallel",)),
    )(x, c, mask_bias,
      r2(params["ln0_a"]), r2(params["ln0_b"]), r2(params["ln1_a"]), r2(params["ln1_b"]),
      w_ada, b_ada, w_qkv, b_qkv,
      w_o, r2(params["b_o"]),
      l_block, w_g1, r2(params["b_g1"]), w_g2, r2(params["b_g2"]))


# ---------------------------------------------------------------------------
# Pure-JAX reference mirroring the PyTorch forward (eval mode, f32)
# ---------------------------------------------------------------------------
def gra_atten_layer_ref(x, mask, c, params, *, num_heads):
    B, N, D = x.shape
    H = num_heads
    dk = D // H

    def layer_norm(h, gamma, beta, eps=1e-6):
        mean = jnp.mean(h, axis=-1, keepdims=True)
        var = jnp.sum((h - mean) ** 2, axis=-1, keepdims=True) / (D - 1)  # torch.std (unbiased)
        return gamma * (h - mean) / (jnp.sqrt(var) + eps) + beta

    def adaln(w, bvec):
        y = (c * jax.nn.sigmoid(c)) @ w + bvec
        return y[..., :D], y[..., D:2 * D], y[..., 2 * D:]

    # sublayer 0: self-attention
    shift0, scale0, gate0 = adaln(params["w_ada0"], params["b_ada0"])
    xm = layer_norm(x, params["ln0_a"], params["ln0_b"]) * (1.0 + scale0) + shift0
    q = xm @ params["w_q"] + params["b_q"]
    k = xm @ params["w_k"] + params["b_k"]
    v = xm @ params["w_v"] + params["b_v"]

    def heads(t):
        return t.reshape(B, N, H, dk).transpose(0, 2, 1, 3)

    qh, kh, vh = heads(q), heads(k), heads(v)
    scores = jnp.einsum("bhqd,bhkd->bhqk", qh, kh) / math.sqrt(dk)
    scores = jnp.where(mask[None, None, :, :] > 0, scores, -1e9)
    p = jax.nn.softmax(scores, axis=-1)
    attn = jnp.einsum("bhqk,bhkd->bhqd", p, vh).transpose(0, 2, 1, 3).reshape(B, N, D)
    attn = attn @ params["w_o"] + params["b_o"]
    x1 = x + gate0 * attn

    # sublayer 1: GraphNet feed-forward
    shift1, scale1, gate1 = adaln(params["w_ada1"], params["b_ada1"])
    xm1 = layer_norm(x1, params["ln1_a"], params["ln1_b"]) * (1.0 + scale1) + shift1

    A = params["adj"]
    d_hat = (jnp.sum(A, axis=0) + 1e-5) ** (-0.5)
    L = d_hat[:, None] * A * d_hat[None, :]
    g = jnp.einsum("ij,bjf->bif", L, xm1) @ params["w_g1"] + params["b_g1"]
    g = jnp.maximum(g, 0.0)
    g = jnp.einsum("ij,bjf->bif", L, g) @ params["w_g2"] + params["b_g2"]
    return x1 + gate1 * g


# ---------------------------------------------------------------------------
# Demo / self-check
# ---------------------------------------------------------------------------
if __name__ == "__main__":
    key = jax.random.PRNGKey(0)
    keys = iter(jax.random.split(key, 24))

    B, N, D, H = 2, 16, 128, 4   # small GraFormer-like shapes (dim_model=128, 4 heads)

    x = jax.random.normal(next(keys), (B, N, D), dtype=jnp.float32)
    c = jax.random.normal(next(keys), (B, N, D), dtype=jnp.float32)
    m = (jax.random.uniform(next(keys), (N, N)) > 0.3).astype(jnp.float32)
    mask = jnp.maximum(m, jnp.eye(N, dtype=jnp.float32))   # every node attends to itself

    def linear_init(k, fan_in, shape):
        bound = 1.0 / math.sqrt(fan_in)
        return jax.random.uniform(k, shape, minval=-bound, maxval=bound, dtype=jnp.float32)

    params = {
        # LayerNorm params of the two SublayerConnections
        "ln0_a": 1.0 + 0.1 * jax.random.normal(next(keys), (D,), dtype=jnp.float32),
        "ln0_b": 0.1 * jax.random.normal(next(keys), (D,), dtype=jnp.float32),
        "ln1_a": 1.0 + 0.1 * jax.random.normal(next(keys), (D,), dtype=jnp.float32),
        "ln1_b": 0.1 * jax.random.normal(next(keys), (D,), dtype=jnp.float32),
        # adaLN_modulation Linear(size, 3*size) for each SublayerConnection (stored (in, out))
        "w_ada0": linear_init(next(keys), D, (D, 3 * D)),
        "b_ada0": linear_init(next(keys), D, (3 * D,)),
        "w_ada1": linear_init(next(keys), D, (D, 3 * D)),
        "b_ada1": linear_init(next(keys), D, (3 * D,)),
        # MultiHeadedAttention: four Linear(d_model, d_model)
        "w_q": linear_init(next(keys), D, (D, D)), "b_q": linear_init(next(keys), D, (D,)),
        "w_k": linear_init(next(keys), D, (D, D)), "b_k": linear_init(next(keys), D, (D,)),
        "w_v": linear_init(next(keys), D, (D, D)), "b_v": linear_init(next(keys), D, (D,)),
        "w_o": linear_init(next(keys), D, (D, D)), "b_o": linear_init(next(keys), D, (D,)),
        # GraphNet feed-forward: learnable adjacency (eye init + noise) + two LAM_Gconv linears
        "adj": jnp.eye(N, dtype=jnp.float32)
               + 0.1 * jax.random.uniform(next(keys), (N, N), dtype=jnp.float32),
        "w_g1": linear_init(next(keys), D, (D, 2 * D)),
        "b_g1": linear_init(next(keys), D, (2 * D,)),
        "w_g2": linear_init(next(keys), 2 * D, (2 * D, D)),
        "b_g2": linear_init(next(keys), 2 * D, (D,)),
    }

    out = gra_atten_layer(x, mask, c, params, num_heads=H)
    out = jax.block_until_ready(out)

    ref = gra_atten_layer_ref(x, mask, c, params, num_heads=H)
    assert out.shape == (B, N, D)
    # bf16 MXU operands + approx EUP reciprocals -> loosened tolerance (review note).
    max_err = float(jnp.max(jnp.abs(out - ref)))
    assert jnp.allclose(out, ref, atol=5e-2, rtol=5e-2), max_err

    print("KERNEL_OK")
</pallas_src>

<mosaic_0001>
module attributes {stable_mosaic.version = 11 : i64} {
  func.func @gra_atten_kernel(%arg0: i32, %arg1: memref<2x16x128xf32, #tpu.memory_space<vmem>>, %arg2: memref<2x16x128xf32, #tpu.memory_space<vmem>>, %arg3: memref<32x32xf32, #tpu.memory_space<vmem>>, %arg4: memref<1x128xf32, #tpu.memory_space<vmem>>, %arg5: memref<1x128xf32, #tpu.memory_space<vmem>>, %arg6: memref<1x128xf32, #tpu.memory_space<vmem>>, %arg7: memref<1x128xf32, #tpu.memory_space<vmem>>, %arg8: memref<128x768xbf16, #tpu.memory_space<vmem>>, %arg9: memref<1x768xf32, #tpu.memory_space<vmem>>, %arg10: memref<128x384xbf16, #tpu.memory_space<vmem>>, %arg11: memref<1x384xf32, #tpu.memory_space<vmem>>, %arg12: memref<128x128xbf16, #tpu.memory_space<vmem>>, %arg13: memref<1x128xf32, #tpu.memory_space<vmem>>, %arg14: memref<32x32xbf16, #tpu.memory_space<vmem>>, %arg15: memref<128x256xbf16, #tpu.memory_space<vmem>>, %arg16: memref<1x256xf32, #tpu.memory_space<vmem>>, %arg17: memref<256x128xbf16, #tpu.memory_space<vmem>>, %arg18: memref<1x128xf32, #tpu.memory_space<vmem>>, %arg19: memref<2x16x128xf32, #tpu.memory_space<vmem>>, %arg20: memref<32x128xf32, #tpu.memory_space<vmem>>) attributes {dimension_semantics = [#tpu.dimension_semantics<parallel>], iteration_bounds = array<i64: 1>, scalar_prefetch = 0 : i64, scratch_operands = 1 : i64, tpu.core_type = #tpu.core_type<tc>, window_params = [{transform_indices = @transform_0, window_bounds = array<i64: 2, 16, 128>}, {transform_indices = @transform_1, window_bounds = array<i64: 2, 16, 128>}, {pipeline_mode = #tpu.pipeline_mode<synchronous>, transform_indices = @transform_2, window_bounds = array<i64: 32, 32>}, {pipeline_mode = #tpu.pipeline_mode<synchronous>, transform_indices = @transform_3, window_bounds = array<i64: 1, 128>}, {pipeline_mode = #tpu.pipeline_mode<synchronous>, transform_indices = @transform_4, window_bounds = array<i64: 1, 128>}, {pipeline_mode = #tpu.pipeline_mode<synchronous>, transform_indices = @transform_5, window_bounds = array<i64: 1, 128>}, {pipeline_mode = #tpu.pipeline_mode<synchronous>, transform_indices = @transform_6, window_bounds = array<i64: 1, 128>}, {pipeline_mode = #tpu.pipeline_mode<synchronous>, transform_indices = @transform_7, window_bounds = array<i64: 128, 768>}, {pipeline_mode = #tpu.pipeline_mode<synchronous>, transform_indices = @transform_8, window_bounds = array<i64: 1, 768>}, {pipeline_mode = #tpu.pipeline_mode<synchronous>, transform_indices = @transform_9, window_bounds = array<i64: 128, 384>}, {pipeline_mode = #tpu.pipeline_mode<synchronous>, transform_indices = @transform_10, window_bounds = array<i64: 1, 384>}, {pipeline_mode = #tpu.pipeline_mode<synchronous>, transform_indices = @transform_11, window_bounds = array<i64: 128, 128>}, {pipeline_mode = #tpu.pipeline_mode<synchronous>, transform_indices = @transform_12, window_bounds = array<i64: 1, 128>}, {pipeline_mode = #tpu.pipeline_mode<synchronous>, transform_indices = @transform_13, window_bounds = array<i64: 32, 32>}, {pipeline_mode = #tpu.pipeline_mode<synchronous>, transform_indices = @transform_14, window_bounds = array<i64: 128, 256>}, {pipeline_mode = #tpu.pipeline_mode<synchronous>, transform_indices = @transform_15, window_bounds = array<i64: 1, 256>}, {pipeline_mode = #tpu.pipeline_mode<synchronous>, transform_indices = @transform_16, window_bounds = array<i64: 256, 128>}, {pipeline_mode = #tpu.pipeline_mode<synchronous>, transform_indices = @transform_17, window_bounds = array<i64: 1, 128>}, {transform_indices = @transform_18, window_bounds = array<i64: 2, 16, 128>}]} {
    %c0 = arith.constant 0 : index
    %c0_0 = arith.constant 0 : index
    %c0_1 = arith.constant 0 : index
    %0 = vector.load %arg1[%c0, %c0_0, %c0_1] : memref<2x16x128xf32, #tpu.memory_space<vmem>>, vector<2x16x128xf32>
    %1 = vector.shape_cast %0 : vector<2x16x128xf32> to vector<32x128xf32>
    %c0_2 = arith.constant 0 : index
    %c0_3 = arith.constant 0 : index
    %c0_4 = arith.constant 0 : index
    %2 = vector.load %arg2[%c0_2, %c0_3, %c0_4] : memref<2x16x128xf32, #tpu.memory_space<vmem>>, vector<2x16x128xf32>
    %3 = vector.shape_cast %2 : vector<2x16x128xf32> to vector<32x128xf32>
    %cst = arith.constant 0.000000e+00 : f32
    %4 = vector.broadcast %cst : f32 to vector<32x128xf32>
    %5 = arith.subf %4, %3 : vector<32x128xf32>
    %6 = math.exp %5 : vector<32x128xf32>
    %cst_5 = arith.constant 1.000000e+00 : f32
    %7 = vector.broadcast %cst_5 : f32 to vector<32x128xf32>
    %8 = arith.addf %7, %6 : vector<32x128xf32>
    %9 = tpu.reciprocal %8 {approx = true} : vector<32x128xf32> -> vector<32x128xf32>
    %10 = arith.mulf %3, %9 : vector<32x128xf32>
    %11 = arith.truncf %10 : vector<32x128xf32> to vector<32x128xbf16>
    %c0_6 = arith.constant 0 : index
    %c0_7 = arith.constant 0 : index
    %12 = vector.load %arg8[%c0_6, %c0_7] : memref<128x768xbf16, #tpu.memory_space<vmem>>, vector<128x768xbf16>
    %cst_8 = arith.constant dense<0.000000e+00> : vector<32x768xf32>
    %13 = tpu.matmul %11, %12, %cst_8 {dimension_numbers = #tpu.dot_dimension_numbers<[1], [0], [0], [1], [0, 0, 1, 1], [], []>} : vector<32x128xbf16>, vector<128x768xbf16>, vector<32x768xf32> -> vector<32x768xf32>
    %c0_9 = arith.constant 0 : index
    %c0_10 = arith.constant 0 : index
    %14 = vector.load %arg9[%c0_9, %c0_10] : memref<1x768xf32, #tpu.memory_space<vmem>>, vector<1x768xf32>
    %15 = vector.broadcast %14 : vector<1x768xf32> to vector<32x768xf32>
    %16 = arith.addf %13, %15 : vector<32x768xf32>
    %17 = vector.extract_strided_slice %16 {offsets = [0, 0], sizes = [32, 128], strides = [1, 1]} : vector<32x768xf32> to vector<32x128xf32>
    %18 = vector.extract_strided_slice %16 {offsets = [0, 128], sizes = [32, 128], strides = [1, 1]} : vector<32x768xf32> to vector<32x128xf32>
    %19 = vector.extract_strided_slice %16 {offsets = [0, 256], sizes = [32, 128], strides = [1, 1]} : vector<32x768xf32> to vector<32x128xf32>
    %20 = vector.extract_strided_slice %16 {offsets = [0, 384], sizes = [32, 128], strides = [1, 1]} : vector<32x768xf32> to vector<32x128xf32>
    %21 = vector.extract_strided_slice %16 {offsets = [0, 512], sizes = [32, 128], strides = [1, 1]} : vector<32x768xf32> to vector<32x128xf32>
    %22 = vector.extract_strided_slice %16 {offsets = [0, 640], sizes = [32, 128], strides = [1, 1]} : vector<32x768xf32> to vector<32x128xf32>
    %c0_11 = arith.constant 0 : index
    %c0_12 = arith.constant 0 : index
    %23 = vector.load %arg4[%c0_11, %c0_12] : memref<1x128xf32, #tpu.memory_space<vmem>>, vector<1x128xf32>
    %c0_13 = arith.constant 0 : index
    %c0_14 = arith.constant 0 : index
    %24 = vector.load %arg5[%c0_13, %c0_14] : memref<1x128xf32, #tpu.memory_space<vmem>>, vector<1x128xf32>
    %cst_15 = arith.constant dense<0.000000e+00> : vector<32xf32>
    %25 = vector.multi_reduction <add>, %1, %cst_15 [1] : vector<32x128xf32> to vector<32xf32>
    %26 = vector.shape_cast %25 : vector<32xf32> to vector<32x1xf32>
    %cst_16 = arith.constant 1.280000e+02 : f32
    %27 = vector.broadcast %cst_16 : f32 to vector<32x1xf32>
    %28 = arith.divf %26, %27 : vector<32x1xf32>
    %29 = vector.broadcast %28 : vector<32x1xf32> to vector<32x128xf32>
    %30 = arith.subf %1, %29 : vector<32x128xf32>
    %31 = arith.mulf %30, %30 : vector<32x128xf32>
    %cst_17 = arith.constant dense<0.000000e+00> : vector<32xf32>
    %32 = vector.multi_reduction <add>, %31, %cst_17 [1] : vector<32x128xf32> to vector<32xf32>
    %33 = vector.shape_cast %32 : vector<32xf32> to vector<32x1xf32>
    %cst_18 = arith.constant 0.00787401571 : f32
    %34 = vector.broadcast %cst_18 : f32 to vector<32x1xf32>
    %35 = arith.mulf %33, %34 : vector<32x1xf32>
    %36 = math.sqrt %35 : vector<32x1xf32>
    %cst_19 = arith.constant 9.99999997E-7 : f32
    %37 = vector.broadcast %cst_19 : f32 to vector<32x1xf32>
    %38 = arith.addf %36, %37 : vector<32x1xf32>
    %39 = tpu.reciprocal %38 {approx = true} : vector<32x1xf32> -> vector<32x1xf32>
    %40 = vector.broadcast %39 : vector<32x1xf32> to vector<32x128xf32>
    %41 = arith.mulf %30, %40 : vector<32x128xf32>
    %42 = vector.broadcast %23 : vector<1x128xf32> to vector<32x128xf32>
    %43 = arith.mulf %42, %41 : vector<32x128xf32>
    %44 = vector.broadcast %24 : vector<1x128xf32> to vector<32x128xf32>
    %45 = arith.addf %43, %44 : vector<32x128xf32>
    %cst_20 = arith.constant 1.000000e+00 : f32
    %46 = vector.broadcast %cst_20 : f32 to vector<32x128xf32>
    %47 = arith.addf %46, %18 : vector<32x128xf32>
    %48 = arith.mulf %45, %47 : vector<32x128xf32>
    %49 = arith.addf %48, %17 : vector<32x128xf32>
    %50 = arith.truncf %49 : vector<32x128xf32> to vector<32x128xbf16>
    %c0_21 = arith.constant 0 : index
    %c0_22 = arith.constant 0 : index
    %51 = vector.load %arg10[%c0_21, %c0_22] : memref<128x384xbf16, #tpu.memory_space<vmem>>, vector<128x384xbf16>
    %cst_23 = arith.constant dense<0.000000e+00> : vector<32x384xf32>
    %52 = tpu.matmul %50, %51, %cst_23 {dimension_numbers = #tpu.dot_dimension_numbers<[1], [0], [0], [1], [0, 0, 1, 1], [], []>} : vector<32x128xbf16>, vector<128x384xbf16>, vector<32x384xf32> -> vector<32x384xf32>
    %c0_24 = arith.constant 0 : index
    %c0_25 = arith.constant 0 : index
    %53 = vector.load %arg11[%c0_24, %c0_25] : memref<1x384xf32, #tpu.memory_space<vmem>>, vector<1x384xf32>
    %54 = vector.broadcast %53 : vector<1x384xf32> to vector<32x384xf32>
    %55 = arith.addf %52, %54 : vector<32x384xf32>
    %c0_26 = arith.constant 0 : index
    %c0_27 = arith.constant 0 : index
    %56 = vector.load %arg3[%c0_26, %c0_27] : memref<32x32xf32, #tpu.memory_space<vmem>>, vector<32x32xf32>
    %57 = vector.extract_strided_slice %55 {offsets = [0, 0], sizes = [32, 32], strides = [1, 1]} : vector<32x384xf32> to vector<32x32xf32>
    %58 = arith.truncf %57 : vector<32x32xf32> to vector<32x32xbf16>
    %59 = vector.extract_strided_slice %55 {offsets = [0, 128], sizes = [32, 32], strides = [1, 1]} : vector<32x384xf32> to vector<32x32xf32>
    %60 = arith.truncf %59 : vector<32x32xf32> to vector<32x32xbf16>
    %61 = vector.extract_strided_slice %55 {offsets = [0, 256], sizes = [32, 32], strides = [1, 1]} : vector<32x384xf32> to vector<32x32xf32>
    %62 = arith.truncf %61 : vector<32x32xf32> to vector<32x32xbf16>
    %cst_28 = arith.constant dense<0.000000e+00> : vector<32x32xf32>
    %63 = tpu.matmul %58, %60, %cst_28 {dimension_numbers = #tpu.dot_dimension_numbers<[1], [1], [0], [0], [0, 0, 1, 0], [], []>} : vector<32x32xbf16>, vector<32x32xbf16>, vector<32x32xf32> -> vector<32x32xf32>
    %cst_29 = arith.constant 0.176776692 : f32
    %64 = vector.broadcast %cst_29 : f32 to vector<32x32xf32>
    %65 = arith.mulf %63, %64 : vector<32x32xf32>
    %66 = arith.addf %65, %56 : vector<32x32xf32>
    %cst_30 = arith.constant dense<0xFF800000> : vector<32xf32>
    %67 = vector.multi_reduction <maximumf>, %66, %cst_30 [1] : vector<32x32xf32> to vector<32xf32>
    %68 = vector.shape_cast %67 : vector<32xf32> to vector<32x1xf32>
    %69 = vector.broadcast %68 : vector<32x1xf32> to vector<32x32xf32>
    %70 = arith.subf %66, %69 : vector<32x32xf32>
    %71 = math.exp %70 : vector<32x32xf32>
    %cst_31 = arith.constant dense<0.000000e+00> : vector<32xf32>
    %72 = vector.multi_reduction <add>, %71, %cst_31 [1] : vector<32x32xf32> to vector<32xf32>
    %73 = vector.shape_cast %72 : vector<32xf32> to vector<32x1xf32>
    %74 = tpu.reciprocal %73 {approx = true} : vector<32x1xf32> -> vector<32x1xf32>
    %75 = vector.broadcast %74 : vector<32x1xf32> to vector<32x32xf32>
    %76 = arith.mulf %71, %75 : vector<32x32xf32>
    %77 = arith.truncf %76 : vector<32x32xf32> to vector<32x32xbf16>
    %cst_32 = arith.constant dense<0.000000e+00> : vector<32x32xf32>
    %78 = tpu.matmul %77, %62, %cst_32 {dimension_numbers = #tpu.dot_dimension_numbers<[1], [0], [0], [1], [0, 0, 1, 1], [], []>} : vector<32x32xbf16>, vector<32x32xbf16>, vector<32x32xf32> -> vector<32x32xf32>
    %c0_33 = arith.constant 0 : index
    %c0_34 = arith.constant 0 : index
    %79 = vector.load %arg20[%c0_33, %c0_34] : memref<32x128xf32, #tpu.memory_space<vmem>>, vector<32x32xf32>
    tpu.vector_store %arg20[%c0_33, %c0_34], %78 {strides = array<i32>} : memref<32x128xf32, #tpu.memory_space<vmem>>, vector<32x32xf32>,
    %80 = vector.extract_strided_slice %55 {offsets = [0, 32], sizes = [32, 32], strides = [1, 1]} : vector<32x384xf32> to vector<32x32xf32>
    %81 = arith.truncf %80 : vector<32x32xf32> to vector<32x32xbf16>
    %82 = vector.extract_strided_slice %55 {offsets = [0, 160], sizes = [32, 32], strides = [1, 1]} : vector<32x384xf32> to vector<32x32xf32>
    %83 = arith.truncf %82 : vector<32x32xf32> to vector<32x32xbf16>
    %84 = vector.extract_strided_slice %55 {offsets = [0, 288], sizes = [32, 32], strides = [1, 1]} : vector<32x384xf32> to vector<32x32xf32>
    %85 = arith.truncf %84 : vector<32x32xf32> to vector<32x32xbf16>
    %cst_35 = arith.constant dense<0.000000e+00> : vector<32x32xf32>
    %86 = tpu.matmul %81, %83, %cst_35 {dimension_numbers = #tpu.dot_dimension_numbers<[1], [1], [0], [0], [0, 0, 1, 0], [], []>} : vector<32x32xbf16>, vector<32x32xbf16>, vector<32x32xf32> -> vector<32x32xf32>
    %cst_36 = arith.constant 0.176776692 : f32
    %87 = vector.broadcast %cst_36 : f32 to vector<32x32xf32>
    %88 = arith.mulf %86, %87 : vector<32x32xf32>
    %89 = arith.addf %88, %56 : vector<32x32xf32>
    %cst_37 = arith.constant dense<0xFF800000> : vector<32xf32>
    %90 = vector.multi_reduction <maximumf>, %89, %cst_37 [1] : vector<32x32xf32> to vector<32xf32>
    %91 = vector.shape_cast %90 : vector<32xf32> to vector<32x1xf32>
    %92 = vector.broadcast %91 : vector<32x1xf32> to vector<32x32xf32>
    %93 = arith.subf %89, %92 : vector<32x32xf32>
    %94 = math.exp %93 : vector<32x32xf32>
    %cst_38 = arith.constant dense<0.000000e+00> : vector<32xf32>
    %95 = vector.multi_reduction <add>, %94, %cst_38 [1] : vector<32x32xf32> to vector<32xf32>
    %96 = vector.shape_cast %95 : vector<32xf32> to vector<32x1xf32>
    %97 = tpu.reciprocal %96 {approx = true} : vector<32x1xf32> -> vector<32x1xf32>
    %98 = vector.broadcast %97 : vector<32x1xf32> to vector<32x32xf32>
    %99 = arith.mulf %94, %98 : vector<32x32xf32>
    %100 = arith.truncf %99 : vector<32x32xf32> to vector<32x32xbf16>
    %cst_39 = arith.constant dense<0.000000e+00> : vector<32x32xf32>
    %101 = tpu.matmul %100, %85, %cst_39 {dimension_numbers = #tpu.dot_dimension_numbers<[1], [0], [0], [1], [0, 0, 1, 1], [], []>} : vector<32x32xbf16>, vector<32x32xbf16>, vector<32x32xf32> -> vector<32x32xf32>
    %c0_40 = arith.constant 0 : index
    %c32 = arith.constant 32 : index
    %102 = vector.load %arg20[%c0_40, %c32] : memref<32x128xf32, #tpu.memory_space<vmem>>, vector<32x32xf32>
    tpu.vector_store %arg20[%c0_40, %c32], %101 {strides = array<i32>} : memref<32x128xf32, #tpu.memory_space<vmem>>, vector<32x32xf32>,
    %103 = vector.extract_strided_slice %55 {offsets = [0, 64], sizes = [32, 32], strides = [1, 1]} : vector<32x384xf32> to vector<32x32xf32>
    %104 = arith.truncf %103 : vector<32x32xf32> to vector<32x32xbf16>
    %105 = vector.extract_strided_slice %55 {offsets = [0, 192], sizes = [32, 32], strides = [1, 1]} : vector<32x384xf32> to vector<32x32xf32>
    %106 = arith.truncf %105 : vector<32x32xf32> to vector<32x32xbf16>
    %107 = vector.extract_strided_slice %55 {offsets = [0, 320], sizes = [32, 32], strides = [1, 1]} : vector<32x384xf32> to vector<32x32xf32>
    %108 = arith.truncf %107 : vector<32x32xf32> to vector<32x32xbf16>
    %cst_41 = arith.constant dense<0.000000e+00> : vector<32x32xf32>
    %109 = tpu.matmul %104, %106, %cst_41 {dimension_numbers = #tpu.dot_dimension_numbers<[1], [1], [0], [0], [0, 0, 1, 0], [], []>} : vector<32x32xbf16>, vector<32x32xbf16>, vector<32x32xf32> -> vector<32x32xf32>
    %cst_42 = arith.constant 0.176776692 : f32
    %110 = vector.broadcast %cst_42 : f32 to vector<32x32xf32>
    %111 = arith.mulf %109, %110 : vector<32x32xf32>
    %112 = arith.addf %111, %56 : vector<32x32xf32>
    %cst_43 = arith.constant dense<0xFF800000> : vector<32xf32>
    %113 = vector.multi_reduction <maximumf>, %112, %cst_43 [1] : vector<32x32xf32> to vector<32xf32>
    %114 = vector.shape_cast %113 : vector<32xf32> to vector<32x1xf32>
    %115 = vector.broadcast %114 : vector<32x1xf32> to vector<32x32xf32>
    %116 = arith.subf %112, %115 : vector<32x32xf32>
    %117 = math.exp %116 : vector<32x32xf32>
    %cst_44 = arith.constant dense<0.000000e+00> : vector<32xf32>
    %118 = vector.multi_reduction <add>, %117, %cst_44 [1] : vector<32x32xf32> to vector<32xf32>
    %119 = vector.shape_cast %118 : vector<32xf32> to vector<32x1xf32>
    %120 = tpu.reciprocal %119 {approx = true} : vector<32x1xf32> -> vector<32x1xf32>
    %121 = vector.broadcast %120 : vector<32x1xf32> to vector<32x32xf32>
    %122 = arith.mulf %117, %121 : vector<32x32xf32>
    %123 = arith.truncf %122 : vector<32x32xf32> to vector<32x32xbf16>
    %cst_45 = arith.constant dense<0.000000e+00> : vector<32x32xf32>
    %124 = tpu.matmul %123, %108, %cst_45 {dimension_numbers = #tpu.dot_dimension_numbers<[1], [0], [0], [1], [0, 0, 1, 1], [], []>} : vector<32x32xbf16>, vector<32x32xbf16>, vector<32x32xf32> -> vector<32x32xf32>
    %c0_46 = arith.constant 0 : index
    %c64 = arith.constant 64 : index
    %125 = vector.load %arg20[%c0_46, %c64] : memref<32x128xf32, #tpu.memory_space<vmem>>, vector<32x32xf32>
    tpu.vector_store %arg20[%c0_46, %c64], %124 {strides = array<i32>} : memref<32x128xf32, #tpu.memory_space<vmem>>, vector<32x32xf32>,
    %126 = vector.extract_strided_slice %55 {offsets = [0, 96], sizes = [32, 32], strides = [1, 1]} : vector<32x384xf32> to vector<32x32xf32>
    %127 = arith.truncf %126 : vector<32x32xf32> to vector<32x32xbf16>
    %128 = vector.extract_strided_slice %55 {offsets = [0, 224], sizes = [32, 32], strides = [1, 1]} : vector<32x384xf32> to vector<32x32xf32>
    %129 = arith.truncf %128 : vector<32x32xf32> to vector<32x32xbf16>
    %130 = vector.extract_strided_slice %55 {offsets = [0, 352], sizes = [32, 32], strides = [1, 1]} : vector<32x384xf32> to vector<32x32xf32>
    %131 = arith.truncf %130 : vector<32x32xf32> to vector<32x32xbf16>
    %cst_47 = arith.constant dense<0.000000e+00> : vector<32x32xf32>
    %132 = tpu.matmul %127, %129, %cst_47 {dimension_numbers = #tpu.dot_dimension_numbers<[1], [1], [0], [0], [0, 0, 1, 0], [], []>} : vector<32x32xbf16>, vector<32x32xbf16>, vector<32x32xf32> -> vector<32x32xf32>
    %cst_48 = arith.constant 0.176776692 : f32
    %133 = vector.broadcast %cst_48 : f32 to vector<32x32xf32>
    %134 = arith.mulf %132, %133 : vector<32x32xf32>
    %135 = arith.addf %134, %56 : vector<32x32xf32>
    %cst_49 = arith.constant dense<0xFF800000> : vector<32xf32>
    %136 = vector.multi_reduction <maximumf>, %135, %cst_49 [1] : vector<32x32xf32> to vector<32xf32>
    %137 = vector.shape_cast %136 : vector<32xf32> to vector<32x1xf32>
    %138 = vector.broadcast %137 : vector<32x1xf32> to vector<32x32xf32>
    %139 = arith.subf %135, %138 : vector<32x32xf32>
    %140 = math.exp %139 : vector<32x32xf32>
    %cst_50 = arith.constant dense<0.000000e+00> : vector<32xf32>
    %141 = vector.multi_reduction <add>, %140, %cst_50 [1] : vector<32x32xf32> to vector<32xf32>
    %142 = vector.shape_cast %141 : vector<32xf32> to vector<32x1xf32>
    %143 = tpu.reciprocal %142 {approx = true} : vector<32x1xf32> -> vector<32x1xf32>
    %144 = vector.broadcast %143 : vector<32x1xf32> to vector<32x32xf32>
    %145 = arith.mulf %140, %144 : vector<32x32xf32>
    %146 = arith.truncf %145 : vector<32x32xf32> to vector<32x32xbf16>
    %cst_51 = arith.constant dense<0.000000e+00> : vector<32x32xf32>
    %147 = tpu.matmul %146, %131, %cst_51 {dimension_numbers = #tpu.dot_dimension_numbers<[1], [0], [0], [1], [0, 0, 1, 1], [], []>} : vector<32x32xbf16>, vector<32x32xbf16>, vector<32x32xf32> -> vector<32x32xf32>
    %c0_52 = arith.constant 0 : index
    %c96 = arith.constant 96 : index
    %148 = vector.load %arg20[%c0_52, %c96] : memref<32x128xf32, #tpu.memory_space<vmem>>, vector<32x32xf32>
    tpu.vector_store %arg20[%c0_52, %c96], %147 {strides = array<i32>} : memref<32x128xf32, #tpu.memory_space<vmem>>, vector<32x32xf32>,
    %c0_53 = arith.constant 0 : index
    %c0_54 = arith.constant 0 : index
    %149 = vector.load %arg20[%c0_53, %c0_54] : memref<32x128xf32, #tpu.memory_space<vmem>>, vector<32x128xf32>
    %150 = arith.truncf %149 : vector<32x128xf32> to vector<32x128xbf16>
    %c0_55 = arith.constant 0 : index
    %c0_56 = arith.constant 0 : index
    %151 = vector.load %arg12[%c0_55, %c0_56] : memref<128x128xbf16, #tpu.memory_space<vmem>>, vector<128x128xbf16>
    %cst_57 = arith.constant dense<0.000000e+00> : vector<32x128xf32>
    %152 = tpu.matmul %150, %151, %cst_57 {dimension_numbers = #tpu.dot_dimension_numbers<[1], [0], [0], [1], [0, 0, 1, 1], [], []>} : vector<32x128xbf16>, vector<128x128xbf16>, vector<32x128xf32> -> vector<32x128xf32>
    %c0_58 = arith.constant 0 : index
    %c0_59 = arith.constant 0 : index
    %153 = vector.load %arg13[%c0_58, %c0_59] : memref<1x128xf32, #tpu.memory_space<vmem>>, vector<1x128xf32>
    %154 = vector.broadcast %153 : vector<1x128xf32> to vector<32x128xf32>
    %155 = arith.addf %152, %154 : vector<32x128xf32>
    %156 = arith.mulf %19, %155 : vector<32x128xf32>
    %157 = arith.addf %1, %156 : vector<32x128xf32>
    %c0_60 = arith.constant 0 : index
    %c0_61 = arith.constant 0 : index
    %158 = vector.load %arg6[%c0_60, %c0_61] : memref<1x128xf32, #tpu.memory_space<vmem>>, vector<1x128xf32>
    %c0_62 = arith.constant 0 : index
    %c0_63 = arith.constant 0 : index
    %159 = vector.load %arg7[%c0_62, %c0_63] : memref<1x128xf32, #tpu.memory_space<vmem>>, vector<1x128xf32>
    %cst_64 = arith.constant dense<0.000000e+00> : vector<32xf32>
    %160 = vector.multi_reduction <add>, %157, %cst_64 [1] : vector<32x128xf32> to vector<32xf32>
    %161 = vector.shape_cast %160 : vector<32xf32> to vector<32x1xf32>
    %cst_65 = arith.constant 1.280000e+02 : f32
    %162 = vector.broadcast %cst_65 : f32 to vector<32x1xf32>
    %163 = arith.divf %161, %162 : vector<32x1xf32>
    %164 = vector.broadcast %163 : vector<32x1xf32> to vector<32x128xf32>
    %165 = arith.subf %157, %164 : vector<32x128xf32>
    %166 = arith.mulf %165, %165 : vector<32x128xf32>
    %cst_66 = arith.constant dense<0.000000e+00> : vector<32xf32>
    %167 = vector.multi_reduction <add>, %166, %cst_66 [1] : vector<32x128xf32> to vector<32xf32>
    %168 = vector.shape_cast %167 : vector<32xf32> to vector<32x1xf32>
    %cst_67 = arith.constant 0.00787401571 : f32
    %169 = vector.broadcast %cst_67 : f32 to vector<32x1xf32>
    %170 = arith.mulf %168, %169 : vector<32x1xf32>
    %171 = math.sqrt %170 : vector<32x1xf32>
    %cst_68 = arith.constant 9.99999997E-7 : f32
    %172 = vector.broadcast %cst_68 : f32 to vector<32x1xf32>
    %173 = arith.addf %171, %172 : vector<32x1xf32>
    %174 = tpu.reciprocal %173 {approx = true} : vector<32x1xf32> -> vector<32x1xf32>
    %175 = vector.broadcast %174 : vector<32x1xf32> to vector<32x128xf32>
    %176 = arith.mulf %165, %175 : vector<32x128xf32>
    %177 = vector.broadcast %158 : vector<1x128xf32> to vector<32x128xf32>
    %178 = arith.mulf %177, %176 : vector<32x128xf32>
    %179 = vector.broadcast %159 : vector<1x128xf32> to vector<32x128xf32>
    %180 = arith.addf %178, %179 : vector<32x128xf32>
    %cst_69 = arith.constant 1.000000e+00 : f32
    %181 = vector.broadcast %cst_69 : f32 to vector<32x128xf32>
    %182 = arith.addf %181, %21 : vector<32x128xf32>
    %183 = arith.mulf %180, %182 : vector<32x128xf32>
    %184 = arith.addf %183, %20 : vector<32x128xf32>
    %c0_70 = arith.constant 0 : index
    %c0_71 = arith.constant 0 : index
    %185 = vector.load %arg14[%c0_70, %c0_71] : memref<32x32xbf16, #tpu.memory_space<vmem>>, vector<32x32xbf16>
    %186 = arith.truncf %184 : vector<32x128xf32> to vector<32x128xbf16>
    %cst_72 = arith.constant dense<0.000000e+00> : vector<32x128xf32>
    %187 = tpu.matmul %185, %186, %cst_72 {dimension_numbers = #tpu.dot_dimension_numbers<[1], [0], [0], [1], [0, 0, 1, 1], [], []>} : vector<32x32xbf16>, vector<32x128xbf16>, vector<32x128xf32> -> vector<32x128xf32>
    %188 = arith.truncf %187 : vector<32x128xf32> to vector<32x128xbf16>
    %c0_73 = arith.constant 0 : index
    %c0_74 = arith.constant 0 : index
    %189 = vector.load %arg15[%c0_73, %c0_74] : memref<128x256xbf16, #tpu.memory_space<vmem>>, vector<128x256xbf16>
    %cst_75 = arith.constant dense<0.000000e+00> : vector<32x256xf32>
    %190 = tpu.matmul %188, %189, %cst_75 {dimension_numbers = #tpu.dot_dimension_numbers<[1], [0], [0], [1], [0, 0, 1, 1], [], []>} : vector<32x128xbf16>, vector<128x256xbf16>, vector<32x256xf32> -> vector<32x256xf32>
    %c0_76 = arith.constant 0 : index
    %c0_77 = arith.constant 0 : index
    %191 = vector.load %arg16[%c0_76, %c0_77] : memref<1x256xf32, #tpu.memory_space<vmem>>, vector<1x256xf32>
    %192 = vector.broadcast %191 : vector<1x256xf32> to vector<32x256xf32>
    %193 = arith.addf %190, %192 : vector<32x256xf32>
    %cst_78 = arith.constant 0.000000e+00 : f32
    %194 = vector.broadcast %cst_78 : f32 to vector<32x256xf32>
    %195 = arith.maximumf %193, %194 : vector<32x256xf32>
    %196 = arith.truncf %195 : vector<32x256xf32> to vector<32x256xbf16>
    %cst_79 = arith.constant dense<0.000000e+00> : vector<32x256xf32>
    %197 = tpu.matmul %185, %196, %cst_79 {dimension_numbers = #tpu.dot_dimension_numbers<[1], [0], [0], [1], [0, 0, 1, 1], [], []>} : vector<32x32xbf16>, vector<32x256xbf16>, vector<32x256xf32> -> vector<32x256xf32>
    %198 = arith.truncf %197 : vector<32x256xf32> to vector<32x256xbf16>
    %c0_80 = arith.constant 0 : index
    %c0_81 = arith.constant 0 : index
    %199 = vector.load %arg17[%c0_80, %c0_81] : memref<256x128xbf16, #tpu.memory_space<vmem>>, vector<256x128xbf16>
    %cst_82 = arith.constant dense<0.000000e+00> : vector<32x128xf32>
    %200 = tpu.matmul %198, %199, %cst_82 {dimension_numbers = #tpu.dot_dimension_numbers<[1], [0], [0], [1], [0, 0, 1, 1], [], []>} : vector<32x256xbf16>, vector<256x128xbf16>, vector<32x128xf32> -> vector<32x128xf32>
    %c0_83 = arith.constant 0 : index
    %c0_84 = arith.constant 0 : index
    %201 = vector.load %arg18[%c0_83, %c0_84] : memref<1x128xf32, #tpu.memory_space<vmem>>, vector<1x128xf32>
    %202 = vector.broadcast %201 : vector<1x128xf32> to vector<32x128xf32>
    %203 = arith.addf %200, %202 : vector<32x128xf32>
    %204 = arith.mulf %22, %203 : vector<32x128xf32>
    %205 = arith.addf %157, %204 : vector<32x128xf32>
    %206 = vector.shape_cast %205 : vector<32x128xf32> to vector<2x16x128xf32>
    %c0_85 = arith.constant 0 : index
    %c0_86 = arith.constant 0 : index
    %c0_87 = arith.constant 0 : index
    %207 = vector.load %arg19[%c0_85, %c0_86, %c0_87] : memref<2x16x128xf32, #tpu.memory_space<vmem>>, vector<2x16x128xf32>
    tpu.vector_store %arg19[%c0_85, %c0_86, %c0_87], %206 {strides = array<i32>} : memref<2x16x128xf32, #tpu.memory_space<vmem>>, vector<2x16x128xf32>,
    return
  }
  func.func @transform_0(%arg0: i32) -> (i32, i32, i32) {
    %c0_i32 = arith.constant 0 : i32
    %c0_i32_0 = arith.constant 0 : i32
    %c0_i32_1 = arith.constant 0 : i32
    return %arg0, %c0_i32, %c0_i32_0 : i32, i32, i32
  }
  func.func @transform_1(%arg0: i32) -> (i32, i32, i32) {
    %c0_i32 = arith.constant 0 : i32
    %c0_i32_0 = arith.constant 0 : i32
    %c0_i32_1 = arith.constant 0 : i32
    return %arg0, %c0_i32, %c0_i32_0 : i32, i32, i32
  }
  func.func @transform_2(%arg0: i32) -> (i32, i32) {
    %c0_i32 = arith.constant 0 : i32
    %c0_i32_0 = arith.constant 0 : i32
    %c0_i32_1 = arith.constant 0 : i32
    return %c0_i32, %c0_i32_0 : i32, i32
  }
  func.func @transform_3(%arg0: i32) -> (i32, i32) {
    %c0_i32 = arith.constant 0 : i32
    %c0_i32_0 = arith.constant 0 : i32
    %c0_i32_1 = arith.constant 0 : i32
    return %c0_i32, %c0_i32_0 : i32, i32
  }
  func.func @transform_4(%arg0: i32) -> (i32, i32) {
    %c0_i32 = arith.constant 0 : i32
    %c0_i32_0 = arith.constant 0 : i32
    %c0_i32_1 = arith.constant 0 : i32
    return %c0_i32, %c0_i32_0 : i32, i32
  }
  func.func @transform_5(%arg0: i32) -> (i32, i32) {
    %c0_i32 = arith.constant 0 : i32
    %c0_i32_0 = arith.constant 0 : i32
    %c0_i32_1 = arith.constant 0 : i32
    return %c0_i32, %c0_i32_0 : i32, i32
  }
  func.func @transform_6(%arg0: i32) -> (i32, i32) {
    %c0_i32 = arith.constant 0 : i32
    %c0_i32_0 = arith.constant 0 : i32
    %c0_i32_1 = arith.constant 0 : i32
    return %c0_i32, %c0_i32_0 : i32, i32
  }
  func.func @transform_7(%arg0: i32) -> (i32, i32) {
    %c0_i32 = arith.constant 0 : i32
    %c0_i32_0 = arith.constant 0 : i32
    %c0_i32_1 = arith.constant 0 : i32
    return %c0_i32, %c0_i32_0 : i32, i32
  }
  func.func @transform_8(%arg0: i32) -> (i32, i32) {
    %c0_i32 = arith.constant 0 : i32
    %c0_i32_0 = arith.constant 0 : i32
    %c0_i32_1 = arith.constant 0 : i32
    return %c0_i32, %c0_i32_0 : i32, i32
  }
  func.func @transform_9(%arg0: i32) -> (i32, i32) {
    %c0_i32 = arith.constant 0 : i32
    %c0_i32_0 = arith.constant 0 : i32
    %c0_i32_1 = arith.constant 0 : i32
    return %c0_i32, %c0_i32_0 : i32, i32
  }
  func.func @transform_10(%arg0: i32) -> (i32, i32) {
    %c0_i32 = arith.constant 0 : i32
    %c0_i32_0 = arith.constant 0 : i32
    %c0_i32_1 = arith.constant 0 : i32
    return %c0_i32, %c0_i32_0 : i32, i32
  }
  func.func @transform_11(%arg0: i32) -> (i32, i32) {
    %c0_i32 = arith.constant 0 : i32
    %c0_i32_0 = arith.constant 0 : i32
    %c0_i32_1 = arith.constant 0 : i32
    return %c0_i32, %c0_i32_0 : i32, i32
  }
  func.func @transform_12(%arg0: i32) -> (i32, i32) {
    %c0_i32 = arith.constant 0 : i32
    %c0_i32_0 = arith.constant 0 : i32
    %c0_i32_1 = arith.constant 0 : i32
    return %c0_i32, %c0_i32_0 : i32, i32
  }
  func.func @transform_13(%arg0: i32) -> (i32, i32) {
    %c0_i32 = arith.constant 0 : i32
    %c0_i32_0 = arith.constant 0 : i32
    %c0_i32_1 = arith.constant 0 : i32
    return %c0_i32, %c0_i32_0 : i32, i32
  }
  func.func @transform_14(%arg0: i32) -> (i32, i32) {
    %c0_i32 = arith.constant 0 : i32
    %c0_i32_0 = arith.constant 0 : i32
    %c0_i32_1 = arith.constant 0 : i32
    return %c0_i32, %c0_i32_0 : i32, i32
  }
  func.func @transform_15(%arg0: i32) -> (i32, i32) {
    %c0_i32 = arith.constant 0 : i32
    %c0_i32_0 = arith.constant 0 : i32
    %c0_i32_1 = arith.constant 0 : i32
    return %c0_i32, %c0_i32_0 : i32, i32
  }
  func.func @transform_16(%arg0: i32) -> (i32, i32) {
    %c0_i32 = arith.constant 0 : i32
    %c0_i32_0 = arith.constant 0 : i32
    %c0_i32_1 = arith.constant 0 : i32
    return %c0_i32, %c0_i32_0 : i32, i32
  }
  func.func @transform_17(%arg0: i32) -> (i32, i32) {
    %c0_i32 = arith.constant 0 : i32
    %c0_i32_0 = arith.constant 0 : i32
    %c0_i32_1 = arith.constant 0 : i32
    return %c0_i32, %c0_i32_0 : i32, i32
  }
  func.func @transform_18(%arg0: i32) -> (i32, i32, i32) {
    %c0_i32 = arith.constant 0 : i32
    %c0_i32_0 = arith.constant 0 : i32
    %c0_i32_1 = arith.constant 0 : i32
    return %arg0, %c0_i32, %c0_i32_0 : i32, i32, i32
  }
}

</mosaic_0001>

<bundles_post_ra>
// kernel: tpu_custom_call.1
= control target key start
LH: loop header
LB: loop body
LE: loop exit
PB: predicated region body
PF: predicated region fallthrough
CT: control target
= control target key end

     0   :  { %s4163_s0 = inlined_call_operand.hbm [shape: f32[2,16,128], index: 0, kind: input, shape index: {}]   ;;  %s4164_s1 = inlined_call_operand.hbm [shape: f32[2,16,128], index: 1, kind: input, shape index: {}]   ;;  %s4165_s2 = inlined_call_operand.hbm [shape: f32[32,32], index: 2, kind: input, shape index: {}]   ;;  %s4166_s3 = inlined_call_operand.hbm [shape: f32[1,128], index: 3, kind: input, shape index: {}]   ;;  %s4167_s4 = inlined_call_operand.hbm [shape: f32[1,128], index: 4, kind: input, shape index: {}]   ;;  %s4168_s5 = inlined_call_operand.hbm [shape: f32[1,128], index: 5, kind: input, shape index: {}]   ;;  %s4169_s6 = inlined_call_operand.hbm [shape: f32[1,128], index: 6, kind: input, shape index: {}]   ;;  %s4170_s7 = inlined_call_operand.hbm [shape: bf16[128,768], index: 7, kind: input, shape index: {}]   ;;  %s4171_s8 = inlined_call_operand.vmem [shape: f32[1,768], index: 8, kind: input, shape index: {}]   ;;  %s4172_s9 = inlined_call_operand.hbm [shape: bf16[128,384], index: 9, kind: input, shape index: {}]   ;;  %s4173_s10 = inlined_call_operand.vmem [shape: f32[1,384], index: 10, kind: input, shape index: {}]   ;;  %s4174_s11 = inlined_call_operand.hbm [shape: bf16[128,128], index: 11, kind: input, shape index: {}]   ;;  %s4175_s12 = inlined_call_operand.hbm [shape: f32[1,128], index: 12, kind: input, shape index: {}]   ;;  %s4176_s13 = inlined_call_operand.hbm [shape: bf16[32,32], index: 13, kind: input, shape index: {}]   ;;  %s4177_s14 = inlined_call_operand.hbm [shape: bf16[128,256], index: 14, kind: input, shape index: {}]   ;;  %s4178_s15 = inlined_call_operand.vmem [shape: f32[1,256], index: 15, kind: input, shape index: {}]   ;;  %s4179_s16 = inlined_call_operand.hbm [shape: bf16[256,128], index: 16, kind: input, shape index: {}]   ;;  %s4180_s17 = inlined_call_operand.vmem [shape: f32[1,128], index: 17, kind: input, shape index: {}]   ;;  %s4181_s18 = inlined_call_operand.hbm [shape: f32[2,16,128], index: 18, kind: output, shape index: {}]  }
   0x1   :  { %4182 = sst [smem:[#allocation36_spill]] %s4163_s0 }
   0x2   :  { %4183 = sst [smem:[#allocation37_spill]] %s4164_s1 }
   0x3   :  { %4184 = sst [smem:[#allocation38_spill]] %s4165_s2 }
   0x4   :  { %23 = vsyncpa [#allocation4], 0 }
   0x5   :  { %24 = vsyncpa [#allocation7], 0 }
   0x6   :  { %25 = vsyncpa [#allocation10], 0 }
   0x7   :  { %26 = vsyncpa [#allocation13], 0 }
   0x8   :  { %27 = vsyncpa [#allocation16], 0 }
   0x9   :  { %28 = vsyncpa [#allocation19], 0 }
   0xa   :  { %29 = vsyncpa [#allocation22], 0 }
   0xb   :  { %30 = vsyncpa [#allocation25], 0 }
   0xc   :  { %31 = vsyncpa [#allocation5], 0  ;;  %s4185_s29 = sld [smem:[#allocation37_spill]]  ;;  %s3434_s0 = smov [#allocation6]  }
   0xd   :  { %s51_s19 = sshll.u32 %s3434_s0, 4  ;;  %s76_s21 = sshll.u32 %s4166_s3, 4  ;;  %s52_s19 = int_to_ptr.vmem [resolvable:$true] %s51_s19  ;;  %s77_s21 = int_to_ptr.hbm [resolvable:$true] %s76_s21 }
   0xe   :  { %s3435_s22 = smov 128   ;;  %s3436_s2 = smov 8  }
   0xf   :  { %s3437_s23 = smov [#allocation9]   ;;  %s98_s27 = sshll.u32 %s4168_s5, 4  ;;  %s99_s27 = int_to_ptr.hbm [resolvable:$true] %s98_s27 }
  0x10   :  { %s78_s24 = sshll.u32 %s3437_s23, 4  ;;  %s119_s3 = sshll.u32 %s4170_s7, 4  ;;  %s79_s24 = int_to_ptr.vmem [resolvable:$true] %s78_s24  ;;  %s120_s3 = int_to_ptr.hbm [resolvable:$true] %s119_s3 }
  0x11   :  { %81 = dma.hbm_to_vmem [thread:$0]  %s77_s21, 16, %s79_s24, [#allocation10]  }
  0x12   :  { %s49_s30 = sshll.u32 %s4185_s29, 4  ;;  %s3438_s0 = smov [#allocation12]   ;;  %s50_s30 = int_to_ptr.hbm [resolvable:$true] %s49_s30 }
  0x13   :  { %57 = dma.hbm_to_vmem [thread:$0]  %s50_s30, 512, %s52_s19, [#allocation7], %s3435_s22, %s3435_s22, %s3436_s2  }
  0x14   :  { %s100_s1 = sshll.u32 %s3438_s0, 4  ;;  %s3439_s30 = smov [#allocation15]   ;;  %s101_s1 = int_to_ptr.vmem [resolvable:$true] %s100_s1 }
  0x15   :  { %103 = dma.hbm_to_vmem [thread:$0]  %s99_s27, 16, %s101_s1, [#allocation13]  }
  0x16   :  { %s121_s19 = sshll.u32 %s3439_s30, 4  ;;  %s3440_s20 = smov 384   ;;  %s122_s19 = int_to_ptr.vmem [resolvable:$true] %s121_s19 }
  0x17   :  { %s3441_s23 = smov 24   ;;  %s149_s26 = sshll.u32 %s4174_s11, 4  ;;  %s150_s26 = int_to_ptr.hbm [resolvable:$true] %s149_s26 }
  0x18   :  { %127 = dma.hbm_to_vmem [thread:$0]  %s120_s3, 6144, %s122_s19, [#allocation16], %s3440_s20, %s3440_s20, %s3441_s23  }
  0x19   :  { %s3442_s21 = smov [#allocation18]   ;;  %s173_s29 = sshll.u32 %s4176_s13, 4  ;;  %s174_s29 = int_to_ptr.hbm [resolvable:$true] %s173_s29 }
  0x1a   :  { %s151_s24 = sshll.u32 %s3442_s21, 4  ;;  %s3443_s0 = smov 64   ;;  %s152_s24 = int_to_ptr.vmem [resolvable:$true] %s151_s24 }
  0x1b   :  { %s3444_s27 = smov 4   ;;  %s3445_s3 = smov [#allocation21]  }
  0x1c   :  { %157 = dma.hbm_to_vmem [thread:$0]  %s150_s26, 1024, %s152_s24, [#allocation19], %s3443_s0, %s3443_s0, %s3444_s27  }
  0x1d   :  { %s175_s1 = sshll.u32 %s3445_s3, 4  ;;  %s4186_s11 = sld [smem:[#allocation36_spill]]  ;;  %s176_s1 = int_to_ptr.vmem [resolvable:$true] %s175_s1 }
  0x1e   :  { %181 = dma.hbm_to_vmem [thread:$0]  %s174_s29, 256, %s176_s1, [#allocation22], %s3443_s0, %s3443_s0, %s3444_s27  }
  0x1f   :  { %s4187_s25 = sld [smem:[#allocation38_spill]]  ;;  %s3446_s21 = smov [#allocation3]  }
  0x20   :  { %s38_s7 = sshll.u32 %s3446_s21, 4  ;;  %s3447_s26 = smov [#allocation8]   ;;  %s39_s7 = int_to_ptr.vmem [resolvable:$true] %s38_s7 }
  0x21   :  { %s64_s24 = sshll.u32 %s3447_s26, 4  ;;  %s87_s30 = sshll.u32 %s4167_s4, 4  ;;  %s65_s24 = int_to_ptr.vmem [resolvable:$true] %s64_s24  ;;  %s88_s30 = int_to_ptr.hbm [resolvable:$true] %s87_s30 }
  0x22   :  { %s109_s19 = sshll.u32 %s4169_s6, 4  ;;  %s134_s4 = sshll.u32 %s4172_s9, 4  ;;  %s110_s19 = int_to_ptr.hbm [resolvable:$true] %s109_s19  ;;  %s135_s4 = int_to_ptr.hbm [resolvable:$true] %s134_s4 }
  0x23   :  { %s36_s20 = sshll.u32 %s4186_s11, 4  ;;  %s3448_s11 = smov [#allocation11]   ;;  %s37_s20 = int_to_ptr.hbm [resolvable:$true] %s36_s20 }
  0x24   :  { %44 = dma.hbm_to_vmem [thread:$0]  %s37_s20, 512, %s39_s7, [#allocation4], %s3435_s22, %s3435_s22, %s3436_s2  }
  0x25   :  { %s62_s5 = sshll.u32 %s4187_s25, 4  ;;  %s89_s13 = sshll.u32 %s3448_s11, 4  ;;  %s63_s5 = int_to_ptr.hbm [resolvable:$true] %s62_s5  ;;  %s90_s13 = int_to_ptr.vmem [resolvable:$true] %s89_s13 }
  0x26   :  { %70 = dma.hbm_to_vmem [thread:$0]  %s63_s5, 512, %s65_s24, [#allocation7], %s3435_s22, %s3435_s22, %s3436_s2  }
  0x27   :  { %92 = dma.hbm_to_vmem [thread:$0]  %s88_s30, 16, %s90_s13, [#allocation10]  }
  0x28   :  { %s3449_s20 = smov [#allocation14]   ;;  %s3450_s7 = smov [#allocation17]  }
  0x29   :  { %s111_s23 = sshll.u32 %s3449_s20, 4  ;;  %s136_s5 = sshll.u32 %s3450_s7, 4  ;;  %s112_s23 = int_to_ptr.vmem [resolvable:$true] %s111_s23  ;;  %s137_s5 = int_to_ptr.vmem [resolvable:$true] %s136_s5 }
  0x2a   :  { %114 = dma.hbm_to_vmem [thread:$0]  %s110_s19, 16, %s112_s23, [#allocation13]  }
  0x2b   :  { %s163_s6 = sshll.u32 %s4175_s12, 4  ;;  %s3451_s28 = smov 192   ;;  %s164_s6 = int_to_ptr.hbm [resolvable:$true] %s163_s6 }
  0x2c   :  { %s3452_s3 = smov 12   ;;  %s3453_s30 = smov [#allocation20]  }
  0x2d   :  { %142 = dma.hbm_to_vmem [thread:$0]  %s135_s4, 3072, %s137_s5, [#allocation16], %s3451_s28, %s3451_s28, %s3452_s3  }
  0x2e   :  { %s165_s29 = sshll.u32 %s3453_s30, 4  ;;  %s186_s9 = sshll.u32 %s4177_s14, 4  ;;  %s166_s29 = int_to_ptr.vmem [resolvable:$true] %s165_s29  ;;  %s187_s9 = int_to_ptr.hbm [resolvable:$true] %s186_s9 }
  0x2f   :  { %168 = dma.hbm_to_vmem [thread:$0]  %s164_s6, 16, %s166_s29, [#allocation19]  }
  0x30   :  { %s201_s20 = sshll.u32 %s4179_s16, 4  ;;  %s3454_s23 = smov [#allocation23]   ;;  %s202_s20 = int_to_ptr.hbm [resolvable:$true] %s201_s20 }
  0x31   :  { %s188_s25 = sshll.u32 %s3454_s23, 4  ;;  %s3455_s12 = smov [#allocation24]   ;;  %s189_s25 = int_to_ptr.vmem [resolvable:$true] %s188_s25 }
  0x32   :  { %194 = dma.hbm_to_vmem [thread:$0]  %s187_s9, 2048, %s189_s25, [#allocation22], %s3435_s22, %s3435_s22, %s3436_s2  }
  0x33   :  { %s203_s21 = sshll.u32 %s3455_s12, 4  ;;  %s204_s21 = int_to_ptr.vmem [resolvable:$true] %s203_s21 }
  0x34   :  { %209 = dma.hbm_to_vmem [thread:$0]  %s202_s20, 2048, %s204_s21, [#allocation25], %s3443_s0, %s3443_s0, %s3444_s27  }
  0x35   :  { %3416 = dma.done.wait [#allocation4], 512  }
  0x36   :  { %3417 = vsyncadd [#allocation4], 4294966784 }
  0x37   :  { %3418 = dma.done.wait [#allocation7], 1024  }
  0x38   :  { %3419 = vsyncadd [#allocation7], 4294966272 }
  0x39   :  { %3420 = dma.done.wait [#allocation10], 32  }
  0x3a   :  { %3421 = vsyncadd [#allocation10], 4294967264 }
  0x3b   :  { %3422 = dma.done.wait [#allocation13], 32  }
  0x3c   :  { %3423 = vsyncadd [#allocation13], 4294967264 }
  0x3d   :  { %3424 = dma.done.wait [#allocation16], 9216  }
  0x3e   :  { %3425 = vsyncadd [#allocation16], 4294958080 }
  0x3f   :  { %3426 = dma.done.wait [#allocation19], 1040  }
  0x40   :  { %3427 = vsyncadd [#allocation19], 4294966256 }
  0x41   :  { %3428 = dma.done.wait [#allocation22], 2304  }
  0x42   :  { %3429 = vsyncadd [#allocation22], 4294964992 }
  0x43   :  { %3430 = dma.done.wait [#allocation25], 2048  }
  0x44   :  { %3431 = vsyncadd [#allocation25], 4294965248  ;;  %v3618_v0 = vld [vmem:[#allocation3 + $0x10] sm:$0xff]  ;;  %v3620_v1 = vld [vmem:[#allocation3] sm:$0xff]  ;;  %v3456_v37 = vmov 128.0   ;;  %vm1083_vm9 = vcmask 261120  }
  0x45   :  { %725 = vadd.xlane.f32.xlu1 %v3618_v0  ;;  %721 = vadd.xlane.f32.xlu0 %v3620_v1  ;;  %v2825_v2 = vld [vmem:[#allocation15 + $0x154] sm:$0xf]  ;;  %v2477_v3 = vld [vmem:[#allocation15 + $0x168] sm:$0xf0]  ;;  %v2475_v5 = vld [vmem:[#allocation15 + $0x150] sm:$0xf] }
  0x46   :  { %v2480_v4 = vor.u32 %v2825_v2, %v2477_v3  ;;  %v2828_v6 = vld [vmem:[#allocation15 + $0x164] sm:$0xf0]  ;;  %v2819_v7 = vld [vmem:[#allocation15 + $0x124] sm:$0xf]  ;;  %v2453_v9 = vld [vmem:[#allocation15 + $0x138] sm:$0xf0] }
  0x47   :  { %v2476_v8 = vor.u32 %v2828_v6, %v2475_v5  ;;  %v2451_v10 = vld [vmem:[#allocation15 + $0x120] sm:$0xf]  ;;  %v2822_v11 = vld [vmem:[#allocation15 + $0x134] sm:$0xf0]  ;;  %v2456_v12 = vor.u32 %v2819_v7, %v2453_v9  ;;  %v2813_v13 = vld [vmem:[#allocation15 + $0xf4] sm:$0xf] }
  0x48   :  { %624 = vmatpush.bf16.msra.mxu1 %v2480_v4  ;;  %v2429_v14 = vld [vmem:[#allocation15 + $0x108] sm:$0xf0]  ;;  %v3624_v15 = vld [vmem:[#allocation3 + $0x18] sm:$0xff]  ;;  %v3626_v16 = vld [vmem:[#allocation3 + $0x8] sm:$0xff]  ;;  %v2452_v17 = vor.u32 %v2822_v11, %v2451_v10  ;;  %s3458_s7 = smov 32   ;;  %vm1344_vm10 = vcmask 523520  }
  0x49   :  { %605 = vmatpush.bf16.msra.mxu0 %v2476_v8  ;;  %v2427_v18 = vld [vmem:[#allocation15 + $0xf0] sm:$0xf]  ;;  %v2816_v19 = vld [vmem:[#allocation15 + $0x104] sm:$0xf0]  ;;  %v2807_v20 = vld [vmem:[#allocation15 + $0xc4] sm:$0xf]  ;;  %v2432_v21 = vor.u32 %v2813_v13, %v2429_v14 }
  0x4a   :  { %v2405_v22 = vld [vmem:[#allocation15 + $0xd8] sm:$0xf0]  ;;  %v2428_v23 = vor.u32 %v2816_v19, %v2427_v18  ;;  %v2403_v24 = vld [vmem:[#allocation15 + $0xc0] sm:$0xf]  ;;  %v2810_v25 = vld [vmem:[#allocation15 + $0xd4] sm:$0xf0] }
  0x4b   :  { %v2408_v26 = vor.u32 %v2807_v20, %v2405_v22  ;;  %v2801_v27 = vld [vmem:[#allocation15 + $0x94] sm:$0xf]  ;;  %v2381_v28 = vld [vmem:[#allocation15 + $0xa8] sm:$0xf0]  ;;  %v2404_v29 = vor.u32 %v2810_v25, %v2403_v24  ;;  %v273_v31 = vld [vmem:[#allocation6] sm:$0xff]  ;;  %vm1489_vm11 = vcmask 785920  }
  0x4c   :  { %625 = vmatpush.bf16.msra.mxu1 %v2456_v12  ;;  %v2384_v30 = vor.u32 %v2801_v27, %v2381_v28  ;;  %v274_v32 = vld [vmem:[#allocation6 + $0x8] sm:$0xff]  ;;  %v277_v33 = vsub.f32 0.0, %v273_v31  ;;  %v2379_v39 = vld [vmem:[#allocation15 + $0x90] sm:$0xf]  ;;  %v2804_v40 = vld [vmem:[#allocation15 + $0xa4] sm:$0xf0] }
  0x4d   :  { %727 = vadd.xlane.f32.xlu1 %v3624_v15  ;;  %723 = vadd.xlane.f32.xlu0 %v3626_v16  ;;  %v278_v34 = vsub.f32 0.0, %v274_v32  ;;  %v2795_v41 = vld [vmem:[#allocation15 + $0x64] sm:$0xf]  ;;  %v2380_v43 = vor.u32 %v2804_v40, %v2379_v39  ;;  %v2357_v44 = vld [vmem:[#allocation15 + $0x78] sm:$0xf0]  ;;  %v3632_v54 = vld [vmem:[#allocation6 + $0x10] sm:$0xff] }
  0x4e   :  { %606 = vmatpush.bf16.msra.mxu0 %v2452_v17  ;;  %v281_v35 = vmul.f32 1.442695, %v277_v33  ;;  %v2360_v46 = vor.u32 %v2795_v41, %v2357_v44  ;;  %v2355_v49 = vld [vmem:[#allocation15 + $0x60] sm:$0xf]  ;;  %v2798_v50 = vld [vmem:[#allocation15 + $0x74] sm:$0xf0] }
  0x4f   :  { %v283_v36 = vmul.f32 1.442695, %v278_v34  ;;  %v2789_v51 = vld [vmem:[#allocation15 + $0x34] sm:$0xf]  ;;  %v2356_v52 = vor.u32 %v2798_v50, %v2355_v49  ;;  %v2333_v53 = vld [vmem:[#allocation15 + $0x48] sm:$0xf0] }
  0x50   :  { %626 = vmatpush.bf16.msra.mxu1 %v2432_v21  ;;  %2937 = vpow2.f32 %v281_v35  ;;  %v3634_v55 = vld [vmem:[#allocation6 + $0x18] sm:$0xff]  ;;  %v2336_v56 = vor.u32 %v2789_v51, %v2333_v53  ;;  %v279_v57 = vsub.f32 0.0, %v3632_v54  ;;  %v2792_v61 = vld [vmem:[#allocation15 + $0x44] sm:$0xf0]  ;;  %v2783_v62 = vld [vmem:[#allocation15 + $0x4] sm:$0xf] }
  0x51   :  { %2939 = vpow2.f32 %v283_v36  ;;  %v280_v58 = vsub.f32 0.0, %v3634_v55  ;;  %v2331_v60 = vld [vmem:[#allocation15 + $0x30] sm:$0xf]  ;;  %v2309_v3 = vld [vmem:[#allocation15 + $0x18] sm:$0xf0]  ;;  %vm1634_vm12 = vcmask 1048320  }
  0x52   :  { %607 = vmatpush.bf16.msra.mxu0 %v2428_v23  ;;  %2941 = vrcp.f32 %v3456_v37  ;;  %v2332_v2 = vor.u32 %v2792_v61, %v2331_v60  ;;  %v285_v4 = vmul.f32 1.442695, %v279_v57  ;;  %v2312_v7 = vor.u32 %v2783_v62, %v2309_v3  ;;  %v2307_v10 = vld [vmem:[#allocation15] sm:$0xf]  ;;  %v2786_v11 = vld [vmem:[#allocation15 + $0x14] sm:$0xf0] }
  0x53   :  { %v287_v5 = vmul.f32 1.442695, %v280_v58  ;;  %v2308_v14 = vor.u32 %v2786_v11, %v2307_v10  ;;  %v2826_v17 = vld [vmem:[#allocation15 + $0x15c] sm:$0xf]  ;;  %v2485_v18 = vld [vmem:[#allocation15 + $0x170] sm:$0xf0] }
  0x54   :  { %627 = vmatpush.bf16.msra.mxu1 %v2408_v26  ;;  %v2820_v19 = vld [vmem:[#allocation15 + $0x12c] sm:$0xf]  ;;  %v2488_v20 = vor.u32 %v2826_v17, %v2485_v18  ;;  %v2461_v21 = vld [vmem:[#allocation15 + $0x140] sm:$0xf0]  ;;  %v2483_v22 = vld [vmem:[#allocation15 + $0x158] sm:$0xf] }
  0x55   :  { %v2829_v23 = vld [vmem:[#allocation15 + $0x16c] sm:$0xf0]  ;;  %v2814_v25 = vld [vmem:[#allocation15 + $0xfc] sm:$0xf]  ;;  %v2437_v26 = vld [vmem:[#allocation15 + $0x110] sm:$0xf0] }
  0x56   :  { %608 = vmatpush.bf16.msra.mxu0 %v2404_v29  ;;  %v2938_v38 = vpop.eup %2937  ;;  %v2484_v24 = vor.u32 %v2829_v23, %v2483_v22  ;;  %v2491_v27 = vld [vmem:[#allocation15 + $0x160] sm:$0xf]  ;;  %662 = vmatpush.bf16.msra.mxu3 %v2488_v20  ;;  %v2464_v29 = vor.u32 %v2820_v19, %v2461_v21  ;;  %v2459_v37 = vld [vmem:[#allocation15 + $0x128] sm:$0xf]  ;;  %v2467_v41 = vld [vmem:[#allocation15 + $0x130] sm:$0xf] }
  0x57   :  { %v2940_v42 = vpop.eup %2939  ;;  %v289_v45 = vadd.f32 1.0, %v2938_v38  ;;  %v2823_v38 = vld [vmem:[#allocation15 + $0x13c] sm:$0xf0]  ;;  %v2435_v49 = vld [vmem:[#allocation15 + $0xf8] sm:$0xf]  ;;  %s2285_s30 = sshll.u32 %s4181_s18, 4  ;;  %s2286_s30 = int_to_ptr.hbm [resolvable:$true] %s2285_s30 }
  0x58   :  { %628 = vmatpush.bf16.msra.mxu1 %v2384_v30  ;;  %v290_v47 = vadd.f32 1.0, %v2940_v42  ;;  %v3630_v48 = vpop.eup %2941  ;;  %v2830_v30 = vld [vmem:[#allocation15 + $0x174] sm:$0xf0]  ;;  %643 = vmatpush.bf16.msra.mxu2 %v2484_v24  ;;  %v2460_v40 = vor.u32 %v2823_v38, %v2459_v37  ;;  %v2824_v42 = vld [vmem:[#allocation15 + $0x144] sm:$0xf0] }
  0x59   :  { %2943 = vrcp.f32 %v289_v45  ;;  %v730_v59 = vmul.f32 128.0, %v3630_v48  ;;  %v2492_v35 = vor.u32 %v2830_v30, %v2491_v27  ;;  %v2440_v45 = vor.u32 %v2814_v25, %v2437_v26  ;;  %v2817_v50 = vld [vmem:[#allocation15 + $0x10c] sm:$0xf0]  ;;  %v2808_v51 = vld [vmem:[#allocation15 + $0xcc] sm:$0xf] }
  0x5a   :  { %609 = vmatpush.bf16.msra.mxu0 %v2380_v43  ;;  %2945 = vrcp.f32 %v290_v47  ;;  %v2821_v43 = vld [vmem:[#allocation15 + $0x134] sm:$0xf]  ;;  %663 = vmatpush.bf16.msra.mxu3 %v2464_v29  ;;  %v2469_v47 = vld [vmem:[#allocation15 + $0x148] sm:$0xf0]  ;;  %v2443_v57 = vld [vmem:[#allocation15 + $0x100] sm:$0xf]  ;;  %vm734_vm0 = vweird.f32 %v3630_v48 }
  0x5b   :  { %2947 = vpow2.f32 %v285_v4  ;;  %v731_v12 = vsub.f32 1.0, %v730_v59  ;;  %v2472_v53 = vor.u32 %v2821_v43, %v2469_v47  ;;  %v2818_v58 = vld [vmem:[#allocation15 + $0x114] sm:$0xf0]  ;;  %v2815_v59 = vld [vmem:[#allocation15 + $0x104] sm:$0xf] }
  0x5c   :  { %629 = vmatpush.bf16.msra.mxu1 %v2360_v46  ;;  %2949 = vpow2.f32 %v287_v5  ;;  %v2468_v46 = vor.u32 %v2824_v42, %v2467_v41  ;;  %644 = vmatpush.bf16.msra.mxu2 %v2460_v40  ;;  %v2445_v60 = vld [vmem:[#allocation15 + $0x118] sm:$0xf0]  ;;  %v2444_v61 = vor.u32 %v2818_v58, %v2443_v57  ;;  %v2796_v29 = vld [vmem:[#allocation15 + $0x6c] sm:$0xf]  ;;  %v2365_v30 = vld [vmem:[#allocation15 + $0x80] sm:$0xf0] }
  0x5d   :  { %v732_v44 = vmul.f32 %v3630_v48, %v731_v12  ;;  %v2448_v62 = vor.u32 %v2815_v59, %v2445_v60  ;;  %v2387_v37 = vld [vmem:[#allocation15 + $0x98] sm:$0xf]  ;;  %v2341_v40 = vld [vmem:[#allocation15 + $0x50] sm:$0xf0]  ;;  %v2395_v41 = vld [vmem:[#allocation15 + $0xa0] sm:$0xf] }
  0x5e   :  { %610 = vmatpush.bf16.msra.mxu0 %v2356_v52  ;;  %v2413_v52 = vld [vmem:[#allocation15 + $0xe0] sm:$0xf0]  ;;  %664 = vmatpush.bf16.msra.mxu3 %v2440_v45  ;;  %v2806_v43 = vld [vmem:[#allocation15 + $0xb4] sm:$0xf0]  ;;  %v2397_v45 = vld [vmem:[#allocation15 + $0xb8] sm:$0xf0] }
  0x5f   :  { %v2944_v63 = vpop.eup %2943  ;;  %v733_v3 = vadd.f32 %v3630_v48, %v732_v44  ;;  %v2416_v4 = vor.u32 %v2808_v51, %v2413_v52  ;;  %v2803_v44 = vld [vmem:[#allocation15 + $0xa4] sm:$0xf]  ;;  %v2784_v52 = vld [vmem:[#allocation15 + $0xc] sm:$0xf]  ;;  %v2800_v58 = vld [vmem:[#allocation15 + $0x84] sm:$0xf0] }
  0x60   :  { %630 = vmatpush.bf16.msra.mxu1 %v2336_v56  ;;  %v2946_v6 = vpop.eup %2945  ;;  %v297_v8 = vmul.f32 %v2944_v63, %v273_v31  ;;  %v2827_v31 = vld [vmem:[#allocation15 + $0x164] sm:$0xf]  ;;  %v2436_v56 = vor.u32 %v2817_v50, %v2435_v49  ;;  %v2411_v63 = vld [vmem:[#allocation15 + $0xc8] sm:$0xf]  ;;  %v2400_v47 = vor.u32 %v2803_v44, %v2397_v45  ;;  %v2799_v50 = vld [vmem:[#allocation15 + $0x7c] sm:$0xf0] }
  0x61   :  { %v298_v9 = vmul.f32 %v2946_v6, %v274_v32  ;;  %v2948_v28 = vpop.eup %2947  ;;  %v2493_v32 = vld [vmem:[#allocation15 + $0x178] sm:$0xf0]  ;;  %v3649_v12 = vsel %vm734_vm0, %v3630_v48, %v733_v3  ;;  %v2363_v49 = vld [vmem:[#allocation15 + $0x68] sm:$0xf]  ;;  %v2797_v59 = vld [vmem:[#allocation15 + $0x74] sm:$0xf] }
  0x62   :  { %611 = vmatpush.bf16.msra.mxu0 %v2332_v2  ;;  %v2950_v33 = vpop.eup %2949  ;;  %v291_v34 = vadd.f32 1.0, %v2948_v28  ;;  %v2496_v36 = vor.u32 %v2827_v31, %v2493_v32  ;;  %v2811_v2 = vld [vmem:[#allocation15 + $0xdc] sm:$0xf0]  ;;  %645 = vmatpush.bf16.msra.mxu2 %v2436_v56  ;;  %v2802_v6 = vld [vmem:[#allocation15 + $0x9c] sm:$0xf]  ;;  %v2368_v32 = vor.u32 %v2796_v29, %v2365_v30  ;;  %v2364_v51 = vor.u32 %v2799_v50, %v2363_v49 }
  0x63   :  { %v3639_v13 = vpack.c.bf16 %v298_v9, %v297_v8  ;;  %v292_v39 = vadd.f32 1.0, %v2950_v33  ;;  %v2412_v8 = vor.u32 %v2811_v2, %v2411_v63  ;;  %665 = vmatpush.bf16.msra.mxu3 %v2416_v4  ;;  %v2419_v31 = vld [vmem:[#allocation15 + $0xd0] sm:$0xf]  ;;  %v2812_v33 = vld [vmem:[#allocation15 + $0xe4] sm:$0xf0] }
  0x64   :  { %631 = vmatpush.bf16.msra.mxu1 %v2312_v7  ;;  %2951 = vrcp.f32 %v291_v34  ;;  %v2389_v7 = vld [vmem:[#allocation15 + $0xb0] sm:$0xf0]  ;;  %v2371_v56 = vld [vmem:[#allocation15 + $0x70] sm:$0xf]  ;;  %v2373_v60 = vld [vmem:[#allocation15 + $0x88] sm:$0xf0] }
  0x65   :  { %2953 = vrcp.f32 %v292_v39  ;;  %v2809_v34 = vld [vmem:[#allocation15 + $0xd4] sm:$0xf]  ;;  %v2790_v39 = vld [vmem:[#allocation15 + $0x3c] sm:$0xf]  ;;  %v2339_v63 = vld [vmem:[#allocation15 + $0x38] sm:$0xf] }
  0x66   :  { %612 = vmatpush.bf16.msra.mxu0 %v2308_v14  ;;  %v2392_v14 = vor.u32 %v2802_v6, %v2389_v7  ;;  %646 = vmatpush.bf16.msra.mxu2 %v2412_v8  ;;  %v2344_v42 = vor.u32 %v2790_v39, %v2341_v40  ;;  %v2793_v2 = vld [vmem:[#allocation15 + $0x4c] sm:$0xf0]  ;;  %v2347_v4 = vld [vmem:[#allocation15 + $0x40] sm:$0xf]  ;;  %v2791_v6 = vld [vmem:[#allocation15 + $0x44] sm:$0xf] }
  0x67   :  { %632 = vmatmul.bf16.vlgmr.msra.gmra.mxu1 %v3639_v13  ;;  %v2340_v3 = vor.u32 %v2793_v2, %v2339_v63  ;;  %v2349_v8 = vld [vmem:[#allocation15 + $0x58] sm:$0xf0]  ;;  %v2559_v39 = vld [vmem:[#allocation17 + $0x78] sm:$0xf]  ;;  %v2847_v40 = vld [vmem:[#allocation17 + $0x80] sm:$0xf0] }
  0x68   :  { %700 = vmatpush.bf16.msrb.mxu1 %v2496_v36  ;;  %666 = vmatpush.bf16.msra.mxu3 %v2392_v14  ;;  %v2854_v29 = vld [vmem:[#allocation17 + $0xb8] sm:$0xf0]  ;;  %v2848_v44 = vld [vmem:[#allocation17 + $0x88] sm:$0xf0]  ;;  %v2547_v50 = vld [vmem:[#allocation17 + $0x60] sm:$0xf] }
  0x69   :  { %613 = vmatmul.bf16.vlgmr.msra.gmra.mxu0 %v3639_v13  ;;  %v2840_v2 = vld [vmem:[#allocation17 + $0x4c] sm:$0xf] }
  0x6a   :  { %681 = vmatpush.bf16.msrb.mxu0 %v2492_v35  ;;  %v2952_v5 = vpop.eup %2951  ;;  %v2421_v35 = vld [vmem:[#allocation15 + $0xe8] sm:$0xf0] }
  0x6b   :  { %v2954_v9 = vpop.eup %2953  ;;  %v299_v10 = vmul.f32 %v2952_v5, %v3632_v54  ;;  %v2424_v36 = vor.u32 %v2809_v34, %v2421_v35  ;;  %v2794_v5 = vld [vmem:[#allocation15 + $0x54] sm:$0xf0]  ;;  %v2849_v34 = vld [vmem:[#allocation17 + $0x94] sm:$0xf] }
  0x6c   :  { %701 = vmatpush.bf16.msrb.mxu1 %v2472_v53  ;;  %v300_v11 = vmul.f32 %v2954_v9, %v3634_v55  ;;  %667 = vmatpush.bf16.msra.mxu3 %v2368_v32  ;;  %v2317_v53 = vld [vmem:[#allocation15 + $0x20] sm:$0xf0]  ;;  %v2348_v7 = vor.u32 %v2794_v5, %v2347_v4  ;;  %v2315_v9 = vld [vmem:[#allocation15 + $0x8] sm:$0xf]  ;;  %v2571_v32 = vld [vmem:[#allocation17 + $0x90] sm:$0xf] }
  0x6d   :  { %v2320_v57 = vor.u32 %v2784_v52, %v2317_v53 }
  0x6e   :  { %682 = vmatpush.bf16.msrb.mxu0 %v2468_v46  ;;  %v3651_v17 = vpack.c.bf16 %v300_v11, %v299_v10  ;;  %v2396_v46 = vor.u32 %v2806_v43, %v2395_v41  ;;  %v2787_v10 = vld [vmem:[#allocation15 + $0x1c] sm:$0xf0]  ;;  %v2352_v11 = vor.u32 %v2791_v6, %v2349_v8  ;;  %v2846_v41 = vld [vmem:[#allocation17 + $0x7c] sm:$0xf] }
  0x6f   :  { %v2316_v14 = vor.u32 %v2787_v10, %v2315_v9  ;;  %v2567_v43 = vld [vmem:[#allocation17 + $0x80] sm:$0xf]  ;;  %v2842_v8 = vld [vmem:[#allocation17 + $0x58] sm:$0xf0] }
  0x70   :  { %702 = vmatpush.bf16.msrb.mxu1 %v2448_v62  ;;  %668 = vmatpush.bf16.msra.mxu3 %v2344_v42  ;;  %v2376_v62 = vor.u32 %v2797_v59, %v2373_v60  ;;  %v2561_v42 = vld [vmem:[#allocation17 + $0x84] sm:$0xf0]  ;;  %v2845_v60 = vld [vmem:[#allocation17 + $0x70] sm:$0xf0] }
  0x71   :  { %v2564_v45 = vor.u32 %v2846_v41, %v2561_v42  ;;  %v2555_v59 = vld [vmem:[#allocation17 + $0x68] sm:$0xf] }
  0x72   :  { %683 = vmatpush.bf16.msrb.mxu0 %v2444_v61  ;;  %v2372_v61 = vor.u32 %v2800_v58, %v2371_v56  ;;  %v2549_v58 = vld [vmem:[#allocation17 + $0x6c] sm:$0xf0]  ;;  %v2556_v5 = vor.u32 %v2845_v60, %v2555_v59  ;;  %v2507_v59 = vld [vmem:[#allocation17 + $0x8] sm:$0xf]  ;;  %v2833_v60 = vld [vmem:[#allocation17 + $0x10] sm:$0xf0] }
  0x74   :  { %703 = vmatpush.bf16.msrb.mxu1 %v2424_v36  ;;  %669 = vmatpush.bf16.msra.mxu3 %v2320_v57  ;;  %v2579_v36 = vld [vmem:[#allocation17 + $0x98] sm:$0xf]  ;;  %v2843_v57 = vld [vmem:[#allocation17 + $0x64] sm:$0xf] }
  0x75   :  { %v2552_v63 = vor.u32 %v2843_v57, %v2549_v58 }
  0x77   :  { %637 = vmatmul.bf16.gmra.mxu1 %v3651_v17  ;;  %670 = vmatmul.bf16.vlgmr.msra.gmra.mxu3 %v3639_v13 }
  0x78   :  { %704 = vmatpush.bf16.msrb.mxu1 %v2400_v47 }
  0x79   :  { %618 = vmatmul.bf16.gmra.mxu0 %v3651_v17 }
  0x7c   :  { %705 = vmatpush.bf16.msrb.mxu1 %v2376_v62  ;;  %v2841_v62 = vld [vmem:[#allocation17 + $0x50] sm:$0xf0] }
  0x80   :  { %706 = vmatpush.bf16.msrb.mxu1 %v2352_v11 }
  0x87   :  { %675 = vmatmul.bf16.gmra.mxu3 %v3651_v17 }
  0xb8   :  { %v726_v18 = vpop.xlane.xlu1 %725  ;;  %v722_v19 = vpop.xlane.xlu0 %721 }
  0xb9   :  { %v738_v20 = vmul.f32 %v3649_v12, %v726_v18  ;;  %v736_v21 = vmul.f32 %v3649_v12, %v722_v19  ;;  %v2323_v18 = vld [vmem:[#allocation15 + $0x10] sm:$0xf]  ;;  %v2788_v19 = vld [vmem:[#allocation15 + $0x24] sm:$0xf0] }
  0xbb   :  { %v3657_v54 = vsub.f32 %v3618_v0, %v738_v20  ;;  %v3660_v48 = vsub.f32 %v3620_v1, %v736_v21  ;;  %v2785_v20 = vld [vmem:[#allocation15 + $0x14] sm:$0xf]  ;;  %v2324_v21 = vor.u32 %v2788_v19, %v2323_v18  ;;  %v2523_v18 = vld [vmem:[#allocation17 + $0x30] sm:$0xf]  ;;  %v2838_v19 = vld [vmem:[#allocation17 + $0x38] sm:$0xf0] }
  0xbd   :  { %v746_v55 = vmul.f32 %v3657_v54, %v3657_v54  ;;  %v744_v22 = vmul.f32 %v3660_v48, %v3660_v48 }
  0xbf   :  { %752 = vadd.xlane.f32.xlu0 %v746_v55  ;;  %748 = vadd.xlane.f32.xlu2 %v744_v22  ;;  %v2325_v55 = vld [vmem:[#allocation15 + $0x28] sm:$0xf0] }
  0xc0   :  { %v728_v23 = vpop.xlane.xlu1 %727  ;;  %v724_v24 = vpop.xlane.xlu0 %723  ;;  %v2328_v22 = vor.u32 %v2785_v20, %v2325_v55  ;;  %v2837_v20 = vld [vmem:[#allocation17 + $0x34] sm:$0xf] }
  0xc1   :  { %v739_v25 = vmul.f32 %v3649_v12, %v728_v23  ;;  %v737_v0 = vmul.f32 %v3649_v12, %v724_v24  ;;  %v2583_v23 = vld [vmem:[#allocation17 + $0xa8] sm:$0xf]  ;;  %v2853_v24 = vld [vmem:[#allocation17 + $0xb0] sm:$0xf0] }
  0xc2   :  { %707 = vmatpush.bf16.msrb.mxu1 %v2328_v22 }
  0xc3   :  { %v3670_v26 = vsub.f32 %v3624_v15, %v739_v25  ;;  %v3673_v1 = vsub.f32 %v3626_v16, %v737_v0  ;;  %v2420_v15 = vor.u32 %v2812_v33, %v2419_v31  ;;  %v2805_v16 = vld [vmem:[#allocation15 + $0xac] sm:$0xf0]  ;;  %v2852_v25 = vld [vmem:[#allocation17 + $0xac] sm:$0xf]  ;;  %v2584_v0 = vor.u32 %v2853_v24, %v2583_v23  ;;  %v2850_v33 = vld [vmem:[#allocation17 + $0x98] sm:$0xf0] }
  0xc4   :  { %v2388_v38 = vor.u32 %v2805_v16, %v2387_v37  ;;  %v2572_v35 = vor.u32 %v2850_v33, %v2571_v32  ;;  %v2851_v16 = vld [vmem:[#allocation17 + $0xa0] sm:$0xf0]  ;;  %v2524_v23 = vor.u32 %v2838_v19, %v2523_v18  ;;  %v2525_v24 = vld [vmem:[#allocation17 + $0x3c] sm:$0xf0] }
  0xc5   :  { %v747_v27 = vmul.f32 %v3670_v26, %v3670_v26  ;;  %v745_v28 = vmul.f32 %v3673_v1, %v3673_v1  ;;  %684 = vmatpush.bf16.msrb.mxu0 %v2420_v15  ;;  %708 = vmatmul.bf16.vlgmr.msrb.gmra.mxu1 %v3639_v13  ;;  %v2573_v15 = vld [vmem:[#allocation17 + $0x9c] sm:$0xf0]  ;;  %v2835_v33 = vld [vmem:[#allocation17 + $0x20] sm:$0xf0] }
  0xc6   :  { %647 = vmatpush.bf16.msra.mxu2 %v2388_v38  ;;  %v2576_v37 = vor.u32 %v2849_v34, %v2573_v15  ;;  %v2580_v38 = vor.u32 %v2851_v16, %v2579_v36  ;;  %v2513_v15 = vld [vmem:[#allocation17 + $0x24] sm:$0xf0] }
  0xc7   :  { %754 = vadd.xlane.f32.xlu1 %v747_v27  ;;  %750 = vadd.xlane.f32.xlu2 %v745_v28  ;;  %v2585_v27 = vld [vmem:[#allocation17 + $0xb4] sm:$0xf0]  ;;  %v2591_v28 = vld [vmem:[#allocation17 + $0xb0] sm:$0xf] }
  0xc8   :  { %v2588_v30 = vor.u32 %v2852_v25, %v2585_v27  ;;  %v2592_v31 = vor.u32 %v2854_v29, %v2591_v28  ;;  %v2528_v28 = vor.u32 %v2837_v20, %v2525_v24  ;;  %v2531_v29 = vld [vmem:[#allocation17 + $0x38] sm:$0xf] }
  0xc9   :  { %685 = vmatpush.bf16.msrb.mxu0 %v2396_v46  ;;  %v2568_v46 = vor.u32 %v2848_v44, %v2567_v43  ;;  %v2499_v44 = vld [vmem:[#allocation17] sm:$0xf] }
  0xca   :  { %648 = vmatpush.bf16.msra.mxu2 %v2364_v51  ;;  %1035 = vmatpush.bf16.msrb.mxu3 %v2588_v30  ;;  %v2844_v51 = vld [vmem:[#allocation17 + $0x68] sm:$0xf0]  ;;  %v2839_v30 = vld [vmem:[#allocation17 + $0x40] sm:$0xf0] }
  0xcb   :  { %2897 = vmatpush.bf16.msra.mxu1 %v2592_v31  ;;  %v2548_v56 = vor.u32 %v2844_v51, %v2547_v50  ;;  %v2831_v50 = vld [vmem:[#allocation17 + $0x4] sm:$0xf]  ;;  %v2501_v51 = vld [vmem:[#allocation17 + $0xc] sm:$0xf0] }
  0xcd   :  { %686 = vmatpush.bf16.msrb.mxu0 %v2372_v61  ;;  %v2535_v61 = vld [vmem:[#allocation17 + $0x48] sm:$0xf] }
  0xce   :  { %649 = vmatpush.bf16.msra.mxu2 %v2340_v3  ;;  %1036 = vmatpush.bf16.msrb.mxu3 %v2576_v37  ;;  %v2537_v3 = vld [vmem:[#allocation17 + $0x54] sm:$0xf0]  ;;  %v2536_v6 = vor.u32 %v2841_v62, %v2535_v61  ;;  %v2532_v37 = vor.u32 %v2839_v30, %v2531_v29 }
  0xcf   :  { %2898 = vmatpush.bf16.msra.mxu1 %v2580_v38  ;;  %v2540_v9 = vor.u32 %v2840_v2, %v2537_v3 }
  0xd1   :  { %687 = vmatpush.bf16.msrb.mxu0 %v2348_v7  ;;  %v2543_v7 = vld [vmem:[#allocation17 + $0x50] sm:$0xf] }
  0xd2   :  { %650 = vmatpush.bf16.msra.mxu2 %v2316_v14  ;;  %1037 = vmatpush.bf16.msrb.mxu3 %v2564_v45  ;;  %v2544_v14 = vor.u32 %v2842_v8, %v2543_v7  ;;  %v2832_v45 = vld [vmem:[#allocation17 + $0x8] sm:$0xf0] }
  0xd3   :  { %2899 = vmatpush.bf16.msra.mxu1 %v2568_v46 }
  0xd5   :  { %651 = vmatmul.bf16.vlgmr.msra.gmra.mxu2 %v3639_v13  ;;  %688 = vmatpush.bf16.msrb.mxu0 %v2324_v21 }
  0xd6   :  { %1016 = vmatpush.bf16.msrb.mxu2 %v2584_v0  ;;  %1038 = vmatpush.bf16.msrb.mxu3 %v2552_v63  ;;  %v2504_v63 = vor.u32 %v2831_v50, %v2501_v51 }
  0xd7   :  { %2900 = vmatpush.bf16.msra.mxu1 %v2556_v5 }
  0xd8   :  { %689 = vmatmul.bf16.vlgmr.msrb.gmra.mxu0 %v3639_v13  ;;  %v2560_v13 = vor.u32 %v2847_v40, %v2559_v39  ;;  %713 = vmatmul.bf16.gmra.mxu1 %v3651_v17  ;;  %v2836_v39 = vld [vmem:[#allocation17 + $0x28] sm:$0xf0] }
  0xd9   :  { %1054 = vmatpush.bf16.msra.mxu0 %v2592_v31 }
  0xda   :  { %1017 = vmatpush.bf16.msrb.mxu2 %v2572_v35  ;;  %1039 = vmatpush.bf16.msrb.mxu3 %v2540_v9  ;;  %v2834_v35 = vld [vmem:[#allocation17 + $0x1c] sm:$0xf] }
  0xdb   :  { %2901 = vmatpush.bf16.msra.mxu1 %v2544_v14  ;;  %v2516_v41 = vor.u32 %v2834_v35, %v2513_v15 }
  0xdd   :  { %1055 = vmatpush.bf16.msra.mxu0 %v2580_v38  ;;  %v2519_v38 = vld [vmem:[#allocation17 + $0x20] sm:$0xf] }
  0xde   :  { %1018 = vmatpush.bf16.msrb.mxu2 %v2560_v13  ;;  %1040 = vmatpush.bf16.msrb.mxu3 %v2528_v28  ;;  %v2520_v43 = vor.u32 %v2836_v39, %v2519_v38 }
  0xdf   :  { %2902 = vmatpush.bf16.msra.mxu1 %v2532_v37 }
  0xe1   :  { %1056 = vmatpush.bf16.msra.mxu0 %v2568_v46 }
  0xe2   :  { %1019 = vmatpush.bf16.msrb.mxu2 %v2548_v56  ;;  %1041 = vmatpush.bf16.msrb.mxu3 %v2516_v41 }
  0xe3   :  { %2903 = vmatpush.bf16.msra.mxu1 %v2520_v43 }
  0xe4   :  { %v3691_v4 = vpop.f32.mrf.mxu1 }
  0xe5   :  { %656 = vmatmul.bf16.gmra.mxu2 %v3651_v17  ;;  %1057 = vmatpush.bf16.msra.mxu0 %v2556_v5  ;;  %v2508_v5 = vor.u32 %v2833_v60, %v2507_v59 }
  0xe6   :  { %1020 = vmatpush.bf16.msrb.mxu2 %v2536_v6  ;;  %v3703_v32 = vpop.f32.mrf.mxu0  ;;  %1042 = vmatpush.bf16.msrb.mxu3 %v2504_v63 }
  0xe7   :  { %2904 = vmatpush.bf16.msra.mxu1 %v2508_v5 }
  0xe8   :  { %694 = vmatmul.bf16.gmra.mxu0 %v3651_v17  ;;  %v2511_v17 = vld [vmem:[#allocation17 + $0x18] sm:$0xf] }
  0xe9   :  { %1058 = vmatpush.bf16.msra.mxu0 %v2544_v14  ;;  %v2512_v16 = vor.u32 %v2835_v33, %v2511_v17 }
  0xea   :  { %1021 = vmatpush.bf16.msrb.mxu2 %v2524_v23 }
  0xec   :  { %v3705_v42 = vpop.f32.mrf.mxu1 }
  0xed   :  { %1059 = vmatpush.bf16.msra.mxu0 %v2532_v37 }
  0xee   :  { %1022 = vmatpush.bf16.msrb.mxu2 %v2512_v16 }
  0xf1   :  { %1060 = vmatpush.bf16.msra.mxu0 %v2520_v43 }
  0xf5   :  { %1061 = vmatpush.bf16.msra.mxu0 %v2508_v5 }
 0x132   :  { %v749_v47 = vpop.xlane.xlu2 %748  ;;  %v753_v49 = vpop.xlane.xlu0 %752 }
 0x133   :  { %v3684_v52 = vmul.f32 0.007874016, %v749_v47  ;;  %v3686_v53 = vmul.f32 0.007874016, %v753_v49  ;;  %v2500_v49 = vor.u32 %v2832_v45, %v2499_v44  ;;  %v2932_v44 = vld [vmem:[#allocation11] ss:$0 sm:$0xff] }
 0x135   :  { %2955 = vrsqrt.f32 %v3684_v52  ;;  %vm767_vm1 = vcmp.eq.f32.partialorder %v3684_v52, inf  ;;  %vm769_vm2 = vcmp.eq.f32.partialorder %v3684_v52, 0.0  ;;  %v770_v7 = vand.u32 2147483648, %v3684_v52  ;;  %1023 = vmatpush.bf16.msrb.mxu2 %v2500_v49 }
 0x136   :  { %2957 = vrsqrt.f32 %v3686_v53  ;;  %vm791_vm3 = vcmp.eq.f32.partialorder %v3686_v53, inf  ;;  %v794_v14 = vand.u32 2147483648, %v3686_v53  ;;  %vm793_vm4 = vcmp.eq.f32.partialorder %v3686_v53, 0.0 }
 0x13a   :  { %v755_v10 = vpop.xlane.xlu1 %754  ;;  %v751_v11 = vpop.xlane.xlu2 %750 }
 0x13b   :  { %v2956_v21 = vpop.eup %2955  ;;  %v3694_v55 = vmul.f32 0.007874016, %v755_v10  ;;  %v3696_v22 = vmul.f32 0.007874016, %v751_v11  ;;  %v3715_v11 = vpop.f32.mrf.mxu0 }
 0x13c   :  { %v2958_v25 = vpop.eup %2957  ;;  %v761_v0 = vmul.f32 %v2956_v21, %v3684_v52 }
 0x13d   :  { %v785_v27 = vmul.f32 %v2958_v25, %v3686_v53  ;;  %2959 = vrsqrt.f32 %v3694_v55  ;;  %vm803_vm5 = vcmp.eq.f32.partialorder %v3694_v55, inf  ;;  %vm779_vm6 = vcmp.eq.f32.partialorder %v3696_v22, inf }
 0x13e   :  { %v762_v31 = vmul.f32 %v2956_v21, %v761_v0  ;;  %2961 = vrsqrt.f32 %v3696_v22  ;;  %v638_v0 = vpop.f32.mrf.mxu1  ;;  %v782_v17 = vand.u32 2147483648, %v3696_v22  ;;  %vm805_vm7 = vcmp.eq.f32.partialorder %v3694_v55, 0.0 }
 0x13f   :  { %v786_v34 = vmul.f32 %v2958_v25, %v785_v27  ;;  %vm781_vm8 = vcmp.eq.f32.partialorder %v3696_v22, 0.0 }
 0x140   :  { %v763_v36 = vmul.f32 0.5, %v762_v31  ;;  %v3728_v31 = vld [vmem:[%s4171_s8] sm:$0x3f] }
 0x141   :  { %v787_v40 = vmul.f32 0.5, %v786_v34  ;;  %v354_v39 = vperm.slane %v3728_v31, 1 }
 0x142   :  { %v764_v13 = vsub.f32 1.5, %v763_v36 }
 0x143   :  { %v2960_v46 = vpop.eup %2959  ;;  %v788_v47 = vsub.f32 1.5, %v787_v40  ;;  %v619_v37 = vpop.f32.mrf.mxu0  ;;  %v2931_v40 = vld [vmem:[#allocation9] ss:$0 sm:$0xff]  ;;  %v639_v45 = vadd.f32 %v638_v0, %v354_v39  ;;  %v636_v60 = vadd.f32 %v3705_v42, %v354_v39 }
 0x144   :  { %v2962_v56 = vpop.eup %2961  ;;  %v797_v57 = vmul.f32 %v2960_v46, %v3694_v55  ;;  %v765_v58 = vmul.f32 %v2956_v21, %v764_v13 }
 0x145   :  { %v773_v61 = vmul.f32 %v2962_v56, %v3696_v22  ;;  %v789_v62 = vmul.f32 %v2958_v25, %v788_v47 }
 0x146   :  { %v798_v2 = vmul.f32 %v2960_v46, %v797_v57  ;;  %v766_v3 = vmul.f32 %v765_v58, %v3684_v52  ;;  %v836_v58 = vadd.f32 1.0, %v639_v45 }
 0x147   :  { %v774_v6 = vmul.f32 %v2962_v56, %v773_v61  ;;  %v790_v8 = vmul.f32 %v789_v62, %v3686_v53 }
 0x148   :  { %v799_v9 = vmul.f32 0.5, %v798_v2  ;;  %v768_v10 = vsel %vm767_vm1, %v3684_v52, %v766_v3 }
 0x149   :  { %v775_v18 = vmul.f32 0.5, %v774_v6  ;;  %v771_v19 = vsel %vm769_vm2, %v770_v7, %v768_v10  ;;  %v792_v20 = vsel %vm791_vm3, %v3686_v53, %v790_v8  ;;  %v806_v53 = vand.u32 2147483648, %v3694_v55 }
 0x14a   :  { %v808_v21 = vadd.f32 1e-06, %v771_v19  ;;  %v795_v23 = vsel %vm793_vm4, %v794_v14, %v792_v20  ;;  %v800_v24 = vsub.f32 1.5, %v799_v9  ;;  %v835_v14 = vadd.f32 1.0, %v636_v60 }
 0x14b   :  { %v776_v25 = vsub.f32 1.5, %v775_v18  ;;  %v810_v52 = vadd.f32 1e-06, %v795_v23  ;;  %v621_v62 = vpop.f32.mrf.mxu0 }
 0x14c   :  { %2963 = vrcp.f32 %v808_v21  ;;  %v801_v27 = vmul.f32 %v2960_v46, %v800_v24  ;;  %v634_v46 = vadd.f32 %v3691_v4, %v354_v39 }
 0x14d   :  { %v777_v28 = vmul.f32 %v2962_v56, %v776_v25  ;;  %2965 = vrcp.f32 %v810_v52  ;;  %v353_v56 = vperm.slane %v3728_v31, 0 }
 0x14e   :  { %v802_v29 = vmul.f32 %v801_v27, %v3694_v55 }
 0x14f   :  { %v778_v30 = vmul.f32 %v777_v28, %v3696_v22  ;;  %v620_v5 = vadd.f32 %v619_v37, %v353_v56  ;;  %v622_v7 = vadd.f32 %v621_v62, %v353_v56  ;;  %v615_v9 = vadd.f32 %v3703_v32, %v353_v56 }
 0x150   :  { %v804_v33 = vsel %vm803_vm5, %v3694_v55, %v802_v29  ;;  %v640_v55 = vpop.f32.mrf.mxu1  ;;  %v617_v19 = vadd.f32 %v3715_v11, %v353_v56  ;;  %v3749_v32 = vperm.slane %v3728_v31, 2 }
 0x151   :  { %v780_v34 = vsel %vm779_vm6, %v3696_v22, %v778_v30  ;;  %v807_v35 = vsel %vm805_vm7, %v806_v53, %v804_v33  ;;  %v641_v49 = vadd.f32 %v640_v55, %v354_v39  ;;  %v3763_v53 = vpop.f32.mrf.mxu3  ;;  %v880_v39 = vld [vmem:[%s4173_s10] sm:$0x7]  ;;  %s3457_s10 = smov 96  }
 0x152   :  { %v2964_v15 = vpop.eup %2963  ;;  %v783_v36 = vsel %vm781_vm8, %v782_v17, %v780_v34  ;;  %v811_v16 = vadd.f32 1e-06, %v807_v35 }
 0x153   :  { %v2966_v38 = vpop.eup %2965  ;;  %v809_v41 = vadd.f32 1e-06, %v783_v36  ;;  %v816_v13 = vmul.f32 %v2964_v15, %v3660_v48  ;;  %v837_v2 = vadd.f32 1.0, %v641_v49  ;;  %v882_v49 = vperm.slane %v880_v39, 0 }
 0x154   :  { %v818_v43 = vmul.f32 %v2966_v38, %v3657_v54  ;;  %2967 = vrcp.f32 %v811_v16  ;;  %v834_v54 = vadd.f32 1.0, %v634_v46 }
 0x155   :  { %2969 = vrcp.f32 %v809_v41  ;;  %v823_v47 = vmul.f32 %v2931_v40, %v816_v13  ;;  %v3758_v28 = vpop.f32.mrf.mxu0  ;;  %v884_v41 = vperm.slane %v880_v39, 2 }
 0x156   :  { %v825_v22 = vmul.f32 %v2931_v40, %v818_v43 }
 0x157   :  { %v830_v59 = vadd.f32 %v2932_v44, %v823_v47 }
 0x158   :  { %v832_v57 = vadd.f32 %v2932_v44, %v825_v22  ;;  %v3746_v25 = vpop.f32.mrf.mxu2  ;;  %v3756_v27 = vpop.f32.mrf.mxu1 }
 0x159   :  { %v838_v8 = vmul.f32 %v834_v54, %v830_v59  ;;  %v3769_v33 = vpop.f32.mrf.mxu3 }
 0x15a   :  { %v2968_v50 = vpop.eup %2967  ;;  %v840_v3 = vmul.f32 %v836_v58, %v832_v57 }
 0x15b   :  { %v2970_v51 = vpop.eup %2969  ;;  %v819_v48 = vmul.f32 %v2968_v50, %v3670_v26  ;;  %v883_v50 = vperm.slane %v880_v39, 1 }
 0x15c   :  { %v817_v61 = vmul.f32 %v2970_v51, %v3673_v1  ;;  %v844_v42 = vadd.f32 %v840_v3, %v620_v5  ;;  %v842_v1 = vadd.f32 %v838_v8, %v615_v9 }
 0x15d   :  { %v826_v63 = vmul.f32 %v2931_v40, %v819_v48  ;;  %v3767_v31 = vpop.f32.mrf.mxu0 }
 0x15e   :  { %v824_v4 = vmul.f32 %v2931_v40, %v817_v61 }
 0x15f   :  { %v833_v6 = vadd.f32 %v2932_v44, %v826_v63 }
 0x160   :  { %v831_v10 = vadd.f32 %v2932_v44, %v824_v4  ;;  %v654_v52 = vpop.f32.mrf.mxu2  ;;  %v3765_v17 = vpop.f32.mrf.mxu1 }
 0x161   :  { %v841_v26 = vmul.f32 %v837_v2, %v833_v6  ;;  %v3752_v11 = vadd.f32 %v654_v52, %v3749_v32  ;;  %v3775_v15 = vpop.f32.mrf.mxu3 }
 0x162   :  { %v839_v18 = vmul.f32 %v835_v14, %v831_v10 }
 0x163   :  { %v845_v20 = vadd.f32 %v841_v26, %v622_v7 }
 0x164   :  { %v843_v21 = vadd.f32 %v839_v18, %v617_v19 }
 0x165   :  { %v847_v23 = vpack.c.bf16 %v845_v20, %v844_v42  ;;  %v3773_v35 = vpop.f32.mrf.mxu0 }
 0x166   :  { %v846_v24 = vpack.c.bf16 %v843_v21, %v842_v1 }
 0x167   :  { %1067 = vmatmul.bf16.vlgmr.msra.gmra.mxu1 %v847_v23 }
 0x168   :  { %1024 = vmatmul.bf16.vlgmr.msrb.gmra.mxu2 %v846_v24  ;;  %1043 = vmatmul.bf16.vlgmr.msrb.gmra.mxu3 %v846_v24  ;;  %v3754_v0 = vpop.f32.mrf.mxu2  ;;  %v3771_v34 = vpop.f32.mrf.mxu1 }
 0x169   :  { %1062 = vmatmul.bf16.vlgmr.msra.gmra.mxu0 %v846_v24  ;;  %v3781_v16 = vpop.f32.mrf.mxu3 }
 0x16d   :  { %v3779_v37 = vpop.f32.mrf.mxu0 }
 0x170   :  { %v659_v29 = vpop.f32.mrf.mxu2  ;;  %v3777_v36 = vpop.f32.mrf.mxu1 }
 0x171   :  { %v3761_v30 = vadd.f32 %v659_v29, %v3749_v32 }
 0x178   :  { %1029 = vmatmul.bf16.gmra.mxu2 %v847_v23  ;;  %1048 = vmatmul.bf16.gmra.mxu3 %v847_v23 }
 0x1e4   :  { %v1068_v38 = vpop.f32.mrf.mxu1 }
 0x1e5   :  { %v1069_v44 = vadd.f32 %v1068_v38, %v884_v41 }
 0x1e6   :  { %v1063_v40 = vpop.f32.mrf.mxu0 }
 0x1e7   :  { %v1064_v51 = vadd.f32 %v1063_v40, %v884_v41 }
 0x1eb   :  { %v1025_v13 = vpop.f32.mrf.mxu2  ;;  %v1044_v43 = vpop.f32.mrf.mxu3 }
 0x1ec   :  { %v1070_v55 = vpop.f32.mrf.mxu1  ;;  %v1026_v48 = vadd.f32 %v1025_v13, %v882_v49  ;;  %v1045_v59 = vadd.f32 %v1044_v43, %v883_v50 }
 0x1ed   :  { %v1071_v45 = vadd.f32 %v1070_v55, %v884_v41 }
 0x1ee   :  { %v1065_v22 = vpop.f32.mrf.mxu0 }
 0x1ef   :  { %v1066_v46 = vadd.f32 %v1065_v22, %v884_v41  ;;  %v3786_v47 = vpack.c.bf16 %v1071_v45, %v1069_v44  ;;  %v3819_v45 = vld [vmem:[#allocation8] sm:$0xff] }
 0x1f1   :  { %1181 = vmatpush.bf16.msra.mxu2 %v3786_v47  ;;  %v3789_v56 = vpack.c.bf16 %v1066_v46, %v1064_v51  ;;  %v3826_v51 = vld [vmem:[#allocation8 + $0x8] sm:$0xff] }
 0x1f3   :  { %v1027_v57 = vpop.f32.mrf.mxu2  ;;  %v1046_v58 = vpop.f32.mrf.mxu3 }
 0x1f4   :  { %v1028_v54 = vadd.f32 %v1027_v57, %v882_v49  ;;  %v1047_v60 = vadd.f32 %v1046_v58, %v883_v50 }
 0x1f5   :  { %1182 = vmatpush.bf16.msra.mxu2 %v3789_v56 }
 0x1f6   :  { %v1077_v61 = vpack.c.bf16 %v1028_v54, %v1026_v48  ;;  %v1079_v62 = vpack.c.bf16 %v1047_v60, %v1045_v59  ;;  %v3831_v60 = vld [vmem:[#allocation8 + $0x10] sm:$0xff] }
 0x1f8   :  { %1206 = vrot.lane.b32.xlu0 %v1079_v62, %s3457_s10  ;;  %1200 = vrot.lane.b32.xlu1 %v1077_v61, %s3457_s10  ;;  %v1091_v26 = vsel %vm1083_vm9, %v1079_v62, 0 }
 0x1fb   :  { %v1030_v63 = vpop.f32.mrf.mxu2  ;;  %v1049_v2 = vpop.f32.mrf.mxu3 }
 0x1fc   :  { %v1031_v5 = vadd.f32 %v1030_v63, %v882_v49  ;;  %v1050_v6 = vadd.f32 %v1049_v2, %v883_v50 }
 0x200   :  { %1353 = vrot.lane.b32.xlu1 %v1079_v62, %s3443_s0 }
 0x203   :  { %v1032_v4 = vpop.f32.mrf.mxu2  ;;  %v1051_v3 = vpop.f32.mrf.mxu3 }
 0x204   :  { %v1033_v7 = vadd.f32 %v1032_v4, %v882_v49  ;;  %v1052_v8 = vadd.f32 %v1051_v3, %v883_v50  ;;  %v3835_v4 = vld [vmem:[#allocation8 + $0x18] sm:$0xff] }
 0x206   :  { %v1078_v9 = vpack.c.bf16 %v1033_v7, %v1031_v5  ;;  %v1080_v10 = vpack.c.bf16 %v1052_v8, %v1050_v6 }
 0x208   :  { %1494 = vrot.lane.b32.xlu1 %v1077_v61, %s3458_s7  ;;  %1208 = vrot.lane.b32.xlu2 %v1080_v10, %s3457_s10  ;;  %v1094_v14 = vsel %vm1083_vm9, %v1080_v10, 0 }
 0x209   :  { %1202 = vrot.lane.b32.xlu0 %v1078_v9, %s3457_s10  ;;  %1102 = vmatpush.bf16.xpose.msrb.mxu1 %v1094_v14 }
 0x210   :  { %1355 = vrot.lane.b32.xlu2 %v1080_v10, %s3443_s0 }
 0x211   :  { %1498 = vrot.lane.b32.xlu0 %v1079_v62, %s3458_s7  ;;  %1103 = vmatpush.bf16.xpose.msrb.mxu1 %v1091_v26 }
 0x218   :  { %1500 = vrot.lane.b32.xlu2 %v1080_v10, %s3458_s7  ;;  %2593 = vmatmul.msk.bf16.vlgmr.msrb.gmra.mxu1 %vm1083_vm9, %v1077_v61 }
 0x219   :  { %1351 = vrot.lane.b32.xlu0 %v1078_v9, %s3443_s0 }
 0x220   :  { %1349 = vrot.lane.b32.xlu2 %v1077_v61, %s3443_s0 }
 0x228   :  { %1496 = vrot.lane.b32.xlu2 %v1078_v9, %s3458_s7  ;;  %2594 = vmatmul.msk.bf16.gmra.mxu1 %vm1083_vm9, %v1078_v9 }
 0x262   :  { %v1209_v18 = vpop.permute.xlu2 %1208 }
 0x263   :  { %v1220_v19 = vsel %vm1083_vm9, %v1209_v18, 0 }
 0x264   :  { %1228 = vmatpush.bf16.xpose.msra.mxu3 %v1220_v19 }
 0x26a   :  { %v1201_v42 = vpop.permute.xlu1 %1200  ;;  %v1356_v20 = vpop.permute.xlu2 %1355 }
 0x26b   :  { %v1367_v1 = vsel %vm1083_vm9, %v1356_v20, 0  ;;  %v1207_v21 = vpop.permute.xlu0 %1206 }
 0x26c   :  { %v1217_v23 = vsel %vm1083_vm9, %v1207_v21, 0  ;;  %1375 = vmatpush.bf16.xpose.msra.mxu1 %v1367_v1 }
 0x26d   :  { %1229 = vmatpush.bf16.xpose.msra.mxu3 %v1217_v23 }
 0x272   :  { %v1354_v24 = vpop.permute.xlu1 %1353  ;;  %v1501_v52 = vpop.permute.xlu2 %1500 }
 0x273   :  { %v1364_v29 = vsel %vm1083_vm9, %v1354_v24, 0  ;;  %v1512_v38 = vsel %vm1083_vm9, %v1501_v52, 0 }
 0x274   :  { %2597 = vmatmul.msk.bf16.vlgmr.msra.gmra.mxu3 %vm1083_vm9, %v1201_v42  ;;  %1376 = vmatpush.bf16.xpose.msra.mxu1 %v1364_v29 }
 0x275   :  { %1520 = vmatpush.bf16.xpose.msrb.mxu3 %v1512_v38 }
 0x27a   :  { %v1350_v39 = vpop.permute.xlu2 %1349  ;;  %v1495_v55 = vpop.permute.xlu1 %1494 }
 0x27b   :  { %v1203_v40 = vpop.permute.xlu0 %1202  ;;  %2601 = vmatmul.msk.bf16.vlgmr.msra.gmra.mxu1 %vm1083_vm9, %v1350_v39 }
 0x282   :  { %v1497_v59 = vpop.permute.xlu2 %1496 }
 0x283   :  { %v1499_v41 = vpop.permute.xlu0 %1498 }
 0x284   :  { %v1509_v13 = vsel %vm1083_vm9, %v1499_v41, 0  ;;  %2598 = vmatmul.msk.bf16.gmra.mxu3 %vm1083_vm9, %v1203_v40 }
 0x285   :  { %1521 = vmatpush.bf16.xpose.msrb.mxu3 %v1509_v13 }
 0x28b   :  { %v1352_v43 = vpop.permute.xlu0 %1351 }
 0x28c   :  { %2602 = vmatmul.msk.bf16.gmra.mxu1 %vm1083_vm9, %v1352_v43 }
 0x294   :  { %2605 = vmatmul.msk.bf16.vlgmr.msrb.gmra.mxu3 %vm1083_vm9, %v1495_v55 }
 0x295   :  { %v1105_v44 = vpop.f32.mrf.mxu1 }
 0x296   :  { %v1115_v22 = vmul.f32 0.17677669, %v1105_v44 }
 0x298   :  { %v3822_v46 = vadd.f32 %v1115_v22, %v3819_v45 }
 0x29a   :  { %v1123_v49 = vsel %vm1083_vm9, %v3822_v46, -inf }
 0x29b   :  { %1124 = vmax.xlane.f32.xlu1 %v1123_v49 }
 0x29d   :  { %v1107_v50 = vpop.f32.mrf.mxu1 }
 0x29e   :  { %v1116_v57 = vmul.f32 0.17677669, %v1107_v50 }
 0x2a0   :  { %v1120_v58 = vadd.f32 %v1116_v57, %v3826_v51 }
 0x2a2   :  { %v1126_v48 = vsel %vm1083_vm9, %v1120_v58, -inf }
 0x2a3   :  { %1127 = vmax.xlane.f32.xlu0 %v1126_v48 }
 0x2a4   :  { %2606 = vmatmul.msk.bf16.gmra.mxu3 %vm1083_vm9, %v1497_v59 }
 0x2a5   :  { %v1110_v54 = vpop.f32.mrf.mxu1 }
 0x2a6   :  { %v1117_v61 = vmul.f32 0.17677669, %v1110_v54 }
 0x2a8   :  { %v1121_v62 = vadd.f32 %v1117_v61, %v3831_v60 }
 0x2aa   :  { %v1129_v63 = vsel %vm1083_vm9, %v1121_v62, -inf }
 0x2ab   :  { %1130 = vmax.xlane.f32.xlu0 %v1129_v63 }
 0x2ad   :  { %v1112_v2 = vpop.f32.mrf.mxu1 }
 0x2ae   :  { %v1118_v3 = vmul.f32 0.17677669, %v1112_v2 }
 0x2b0   :  { %v1122_v5 = vadd.f32 %v1118_v3, %v3835_v4 }
 0x2b2   :  { %v1132_v6 = vsel %vm1083_vm9, %v1122_v5, -inf }
 0x2b3   :  { %1133 = vmax.xlane.f32.xlu2 %v1132_v6 }
 0x2b4   :  { %1297 = vrot.lane.b32.xlu1 %v3789_v56, %s3457_s10 }
 0x2f7   :  { %v1231_v7 = vpop.f32.mrf.mxu3 }
 0x2f8   :  { %v1378_v8 = vpop.f32.mrf.mxu1  ;;  %v1241_v14 = vmul.f32 0.17677669, %v1231_v7 }
 0x2f9   :  { %v1388_v9 = vmul.f32 0.17677669, %v1378_v8 }
 0x2fa   :  { %v3847_v20 = vadd.f32 %v1241_v14, %v3819_v45 }
 0x2fb   :  { %v3842_v10 = vadd.f32 %v1388_v9, %v3819_v45 }
 0x2fc   :  { %v1249_v24 = vsel %vm1083_vm9, %v3847_v20, -inf }
 0x2fd   :  { %v1396_v26 = vsel %vm1083_vm9, %v3842_v10, -inf }
 0x2fe   :  { %1397 = vmax.xlane.f32.xlu2 %v1396_v26 }
 0x2ff   :  { %v1233_v18 = vpop.f32.mrf.mxu3 }
 0x300   :  { %v1380_v19 = vpop.f32.mrf.mxu1  ;;  %v1242_v21 = vmul.f32 0.17677669, %v1233_v18 }
 0x301   :  { %v1389_v42 = vmul.f32 0.17677669, %v1380_v19 }
 0x302   :  { %v3857_v38 = vadd.f32 %v1242_v21, %v3826_v51 }
 0x303   :  { %v3850_v1 = vadd.f32 %v1389_v42, %v3826_v51 }
 0x304   :  { %v1252_v40 = vsel %vm1083_vm9, %v3857_v38, -inf }
 0x305   :  { %v1399_v23 = vsel %vm1083_vm9, %v3850_v1, -inf }
 0x306   :  { %1400 = vmax.xlane.f32.xlu1 %v1399_v23  ;;  %1250 = vmax.xlane.f32.xlu2 %v1249_v24 }
 0x307   :  { %v1236_v52 = vpop.f32.mrf.mxu3 }
 0x308   :  { %v1243_v6 = vmul.f32 0.17677669, %v1236_v52 }
 0x309   :  { %v1383_v29 = vpop.f32.mrf.mxu1 }
 0x30a   :  { %v1390_v39 = vmul.f32 0.17677669, %v1383_v29  ;;  %v3883_v14 = vadd.f32 %v1243_v6, %v3831_v60 }
 0x30c   :  { %v3862_v13 = vadd.f32 %v1390_v39, %v3831_v60  ;;  %v1255_v19 = vsel %vm1083_vm9, %v3883_v14, -inf }
 0x30e   :  { %1253 = vmax.xlane.f32.xlu1 %v1252_v40  ;;  %v1402_v22 = vsel %vm1083_vm9, %v3862_v13, -inf  ;;  %v1125_v23 = vpop.xlane.xlu1 %1124 }
 0x30f   :  { %v1238_v55 = vpop.f32.mrf.mxu3  ;;  %v1135_v29 = vsub.f32 %v3822_v46, %v1125_v23 }
 0x310   :  { %v1244_v49 = vmul.f32 0.17677669, %v1238_v55 }
 0x311   :  { %v1385_v41 = vpop.f32.mrf.mxu1 }
 0x312   :  { %v1391_v43 = vmul.f32 0.17677669, %v1385_v41  ;;  %v3872_v54 = vadd.f32 %v1244_v49, %v3835_v4  ;;  %v1139_v41 = vmul.f32 1.442695, %v1135_v29 }
 0x314   :  { %v3865_v44 = vadd.f32 %v1391_v43, %v3835_v4  ;;  %v1258_v61 = vsel %vm1083_vm9, %v3872_v54, -inf }
 0x316   :  { %1403 = vmax.xlane.f32.xlu1 %v1402_v22  ;;  %v1405_v50 = vsel %vm1083_vm9, %v3865_v44, -inf  ;;  %v1128_v57 = vpop.xlane.xlu0 %1127 }
 0x317   :  { %1406 = vmax.xlane.f32.xlu0 %v1405_v50  ;;  %v1136_v48 = vsub.f32 %v1120_v58, %v1128_v57  ;;  %v1523_v7 = vpop.f32.mrf.mxu3 }
 0x318   :  { %v1533_v24 = vmul.f32 0.17677669, %v1523_v7 }
 0x319   :  { %v1141_v59 = vmul.f32 1.442695, %v1136_v48 }
 0x31a   :  { %v3897_v39 = vadd.f32 %v1533_v24, %v3819_v45 }
 0x31b   :  { %2971 = vpow2.f32 %v1141_v59 }
 0x31c   :  { %v1541_v55 = vsel %vm1083_vm9, %v3897_v39, -inf }
 0x31e   :  { %1299 = vrot.lane.b32.xlu2 %v3786_v47, %s3457_s10  ;;  %v1131_v63 = vpop.xlane.xlu0 %1130 }
 0x31f   :  { %1259 = vmax.xlane.f32.xlu0 %v1258_v61  ;;  %v1137_v3 = vsub.f32 %v1121_v62, %v1131_v63  ;;  %v1525_v62 = vpop.f32.mrf.mxu3 }
 0x320   :  { %v1534_v46 = vmul.f32 0.17677669, %v1525_v62 }
 0x321   :  { %v3878_v2 = vpop.eup %2971  ;;  %v1143_v8 = vmul.f32 1.442695, %v1137_v3 }
 0x322   :  { %v1150_v58 = vsel %vm1083_vm9, %v3878_v2, 0.0  ;;  %v3911_v57 = vadd.f32 %v1534_v46, %v3826_v51 }
 0x323   :  { %1151 = vadd.xlane.f32.xlu1 %v1150_v58  ;;  %2973 = vpow2.f32 %v1143_v8 }
 0x326   :  { %v1134_v9 = vpop.xlane.xlu2 %1133  ;;  %v1298_v3 = vpop.permute.xlu1 %1297 }
 0x327   :  { %v1138_v26 = vsub.f32 %v1122_v5, %v1134_v9  ;;  %v1528_v40 = vpop.f32.mrf.mxu3 }
 0x328   :  { %v1535_v43 = vmul.f32 0.17677669, %v1528_v40 }
 0x329   :  { %v1145_v18 = vmul.f32 1.442695, %v1138_v26  ;;  %v3887_v42 = vpop.eup %2973 }
 0x32a   :  { %v1153_v5 = vsel %vm1083_vm9, %v3887_v42, 0.0  ;;  %v3902_v22 = vadd.f32 %v1535_v43, %v3831_v60  ;;  %v1544_v60 = vsel %vm1083_vm9, %v3911_v57, -inf }
 0x32b   :  { %2975 = vpow2.f32 %v1145_v18  ;;  %1256 = vmax.xlane.f32.xlu1 %v1255_v19 }
 0x32c   :  { %2977 = vpow2.f32 %v1139_v41  ;;  %v1547_v49 = vsel %vm1083_vm9, %v3902_v22, -inf }
 0x32f   :  { %v1530_v48 = vpop.f32.mrf.mxu3 }
 0x330   :  { %v1536_v59 = vmul.f32 0.17677669, %v1530_v48 }
 0x331   :  { %v3889_v21 = vpop.eup %2975 }
 0x332   :  { %v1156_v52 = vsel %vm1083_vm9, %v3889_v21, 0.0  ;;  %v3906_v50 = vpop.eup %2977  ;;  %v3916_v61 = vadd.f32 %v1536_v59, %v3835_v4 }
 0x333   :  { %1157 = vadd.xlane.f32.xlu0 %v1156_v52  ;;  %1154 = vadd.xlane.f32.xlu1 %v1153_v5  ;;  %v1147_v45 = vsel %vm1083_vm9, %v3906_v50, 0.0 }
 0x334   :  { %v1550_v63 = vsel %vm1083_vm9, %v3916_v61, -inf }
 0x33b   :  { %1542 = vmax.xlane.f32.xlu0 %v1541_v55 }
 0x343   :  { %1548 = vmax.xlane.f32.xlu0 %v1547_v49 }
 0x347   :  { %1148 = vadd.xlane.f32.xlu2 %v1147_v45 }
 0x34f   :  { %1545 = vmax.xlane.f32.xlu2 %v1544_v60 }
 0x357   :  { %1551 = vmax.xlane.f32.xlu2 %v1550_v63  ;;  %1442 = vrot.lane.b32.xlu0 %v3789_v56, %s3443_s0 }
 0x371   :  { %v1398_v6 = vpop.xlane.xlu2 %1397 }
 0x372   :  { %v1408_v51 = vsub.f32 %v3842_v10, %v1398_v6 }
 0x374   :  { %v1412_v58 = vmul.f32 1.442695, %v1408_v51 }
 0x376   :  { %2979 = vpow2.f32 %v1412_v58 }
 0x379   :  { %v1401_v7 = vpop.xlane.xlu1 %1400  ;;  %v1251_v8 = vpop.xlane.xlu2 %1250 }
 0x37a   :  { %v1409_v9 = vsub.f32 %v3850_v1, %v1401_v7  ;;  %v1261_v4 = vsub.f32 %v3847_v20, %v1251_v8 }
 0x37c   :  { %v3925_v26 = vpop.eup %2979  ;;  %v1414_v18 = vmul.f32 1.442695, %v1409_v9  ;;  %v1265_v19 = vmul.f32 1.442695, %v1261_v4 }
 0x37d   :  { %v1420_v62 = vsel %vm1083_vm9, %v3925_v26, 0.0 }
 0x37e   :  { %2981 = vpow2.f32 %v1414_v18  ;;  %1421 = vadd.xlane.f32.xlu2 %v1420_v62 }
 0x37f   :  { %2983 = vpow2.f32 %v1265_v19 }
 0x381   :  { %v1300_v23 = vpop.permute.xlu2 %1299  ;;  %v1254_v10 = vpop.xlane.xlu1 %1253 }
 0x382   :  { %v1262_v24 = vsub.f32 %v3857_v38, %v1254_v10  ;;  %1315 = vmatpush.bf16.msrb.mxu0 %v1300_v23 }
 0x384   :  { %v3930_v52 = vpop.eup %2981  ;;  %v1267_v1 = vmul.f32 1.442695, %v1262_v24 }
 0x385   :  { %v3932_v5 = vpop.eup %2983  ;;  %v1423_v20 = vsel %vm1083_vm9, %v3930_v52, 0.0 }
 0x386   :  { %2985 = vpow2.f32 %v1267_v1  ;;  %1316 = vmatpush.bf16.msrb.mxu0 %v1298_v3  ;;  %1424 = vadd.xlane.f32.xlu0 %v1423_v20  ;;  %v1273_v29 = vsel %vm1083_vm9, %v3932_v5, 0.0 }
 0x387   :  { %1274 = vadd.xlane.f32.xlu1 %v1273_v29 }
 0x389   :  { %v1404_v40 = vpop.xlane.xlu1 %1403 }
 0x38a   :  { %v1410_v41 = vsub.f32 %v3862_v13, %v1404_v40  ;;  %v3945_v46 = vpop.xlane.xlu0 %1406 }
 0x38c   :  { %v3939_v38 = vpop.eup %2985  ;;  %v1416_v43 = vmul.f32 1.442695, %v1410_v41 }
 0x38d   :  { %v1276_v55 = vsel %vm1083_vm9, %v3939_v38, 0.0 }
 0x38e   :  { %2987 = vpow2.f32 %v1416_v43  ;;  %1277 = vadd.xlane.f32.xlu0 %v1276_v55 }
 0x392   :  { %v1260_v59 = vpop.xlane.xlu0 %1259 }
 0x393   :  { %v1264_v63 = vsub.f32 %v3872_v54, %v1260_v59 }
 0x394   :  { %v3943_v49 = vpop.eup %2987 }
 0x395   :  { %v1426_v45 = vsel %vm1083_vm9, %v3943_v49, 0.0  ;;  %v1271_v6 = vmul.f32 1.442695, %v1264_v63 }
 0x396   :  { %1427 = vadd.xlane.f32.xlu2 %v1426_v45  ;;  %v1152_v48 = vpop.xlane.xlu1 %1151 }
 0x39e   :  { %v1257_v60 = vpop.xlane.xlu1 %1256 }
 0x39f   :  { %v1263_v13 = vsub.f32 %v3883_v14, %v1257_v60 }
 0x3a0   :  { %1444 = vrot.lane.b32.xlu1 %v3786_v47, %s3443_s0 }
 0x3a1   :  { %v1269_v3 = vmul.f32 1.442695, %v1263_v13 }
 0x3a3   :  { %2989 = vpow2.f32 %v1269_v3 }
 0x3a4   :  { %2991 = vpow2.f32 %v1271_v6 }
 0x3a6   :  { %v1158_v51 = vpop.xlane.xlu0 %1157  ;;  %v1155_v1 = vpop.xlane.xlu1 %1154 }
 0x3a9   :  { %v3953_v58 = vpop.eup %2989 }
 0x3aa   :  { %v1279_v7 = vsel %vm1083_vm9, %v3953_v58, 0.0  ;;  %v3959_v8 = vpop.eup %2991 }
 0x3ab   :  { %1280 = vadd.xlane.f32.xlu0 %v1279_v7  ;;  %v1282_v4 = vsel %vm1083_vm9, %v3959_v8, 0.0 }
 0x3ae   :  { %1587 = vrot.lane.b32.xlu2 %v3789_v56, %s3458_s7  ;;  %v1543_v14 = vpop.xlane.xlu0 %1542 }
 0x3af   :  { %v1553_v9 = vsub.f32 %v3897_v39, %v1543_v14 }
 0x3b1   :  { %v1557_v54 = vmul.f32 1.442695, %v1553_v9 }
 0x3b3   :  { %2993 = vpow2.f32 %v1557_v54  ;;  %1283 = vadd.xlane.f32.xlu0 %v1282_v4 }
 0x3b4   :  { %2995 = vrcp.f32 %v1152_v48 }
 0x3b6   :  { %v1549_v10 = vpop.xlane.xlu0 %1548 }
 0x3b7   :  { %v1555_v40 = vsub.f32 %v3902_v22, %v1549_v10 }
 0x3b9   :  { %v3964_v18 = vpop.eup %2993  ;;  %v1561_v55 = vmul.f32 1.442695, %v1555_v40 }
 0x3ba   :  { %v1149_v19 = vpop.xlane.xlu2 %1148  ;;  %v1565_v62 = vsel %vm1083_vm9, %v3964_v18, 0.0  ;;  %v2996_v56 = vpop.eup %2995 }
 0x3bb   :  { %1566 = vadd.xlane.f32.xlu0 %v1565_v62  ;;  %2997 = vrcp.f32 %v1149_v19  ;;  %v1164_v39 = vmul.f32 %v2996_v56, %v3878_v2 }
 0x3bc   :  { %2999 = vrcp.f32 %v1155_v1 }
 0x3c1   :  { %v2998_v23 = vpop.eup %2997 }
 0x3c2   :  { %v1546_v24 = vpop.xlane.xlu2 %1545  ;;  %v1163_v20 = vmul.f32 %v2998_v23, %v3906_v50  ;;  %v3000_v48 = vpop.eup %2999 }
 0x3c3   :  { %v1554_v29 = vsub.f32 %v3911_v57, %v1546_v24  ;;  %v1165_v60 = vmul.f32 %v3000_v48, %v3887_v42  ;;  %v1411_v42 = vsub.f32 %v3865_v44, %v3945_v46 }
 0x3c4   :  { %v1167_v41 = vpack.c.bf16 %v1164_v39, %v1163_v20 }
 0x3c5   :  { %v1559_v43 = vmul.f32 1.442695, %v1554_v29 }
 0x3c6   :  { %2595 = vmatmul.msk.bf16.vlgmr.msra.gmra.mxu2 %vm1083_vm9, %v1167_v41 }
 0x3c7   :  { %3001 = vpow2.f32 %v1559_v43 }
 0x3c8   :  { %3003 = vrcp.f32 %v1158_v51 }
 0x3c9   :  { %3005 = vpow2.f32 %v1561_v55  ;;  %v1443_v51 = vpop.permute.xlu0 %1442 }
 0x3ca   :  { %v1552_v45 = vpop.xlane.xlu2 %1551 }
 0x3cb   :  { %v1556_v2 = vsub.f32 %v3916_v61, %v1552_v45 }
 0x3cd   :  { %v3973_v59 = vpop.eup %3001  ;;  %v1563_v22 = vmul.f32 1.442695, %v1556_v2 }
 0x3ce   :  { %v3004_v50 = vpop.eup %3003  ;;  %v1568_v57 = vsel %vm1083_vm9, %v3973_v59, 0.0 }
 0x3cf   :  { %1569 = vadd.xlane.f32.xlu1 %v1568_v57  ;;  %1589 = vrot.lane.b32.xlu0 %v3786_v47, %s3458_s7  ;;  %v1166_v13 = vmul.f32 %v3004_v50, %v3889_v21  ;;  %v3982_v63 = vpop.eup %3005  ;;  %3007 = vpow2.f32 %v1563_v22  ;;  %v1418_v21 = vmul.f32 1.442695, %v1411_v42 }
 0x3d0   :  { %v1571_v61 = vsel %vm1083_vm9, %v3982_v63, 0.0 }
 0x3d1   :  { %v1168_v3 = vpack.c.bf16 %v1166_v13, %v1165_v60  ;;  %3009 = vpow2.f32 %v1418_v21 }
 0x3d5   :  { %v3987_v6 = vpop.eup %3007 }
 0x3d6   :  { %2596 = vmatmul.msk.bf16.gmra.mxu2 %vm1083_vm9, %v1168_v3  ;;  %v1574_v47 = vsel %vm1083_vm9, %v3987_v6, 0.0 }
 0x3d7   :  { %1572 = vadd.xlane.f32.xlu1 %v1571_v61  ;;  %v3993_v7 = vpop.eup %3009 }
 0x3d8   :  { %v1429_v14 = vsel %vm1083_vm9, %v3993_v7, 0.0 }
 0x3df   :  { %1575 = vadd.xlane.f32.xlu1 %v1574_v47 }
 0x3f1   :  { %v1422_v46 = vpop.xlane.xlu2 %1421 }
 0x3f9   :  { %1430 = vadd.xlane.f32.xlu0 %v1429_v14  ;;  %v1425_v9 = vpop.xlane.xlu0 %1424 }
 0x3fa   :  { %v1275_v54 = vpop.xlane.xlu1 %1274 }
 0x3fb   :  { %3011 = vrcp.f32 %v1275_v54 }
 0x401   :  { %v1278_v4 = vpop.xlane.xlu0 %1277  ;;  %v3012_v19 = vpop.eup %3011 }
 0x402   :  { %3013 = vrcp.f32 %v1278_v4  ;;  %v1289_v56 = vmul.f32 %v3012_v19, %v3932_v5 }
 0x403   :  { %3015 = vrcp.f32 %v1425_v9 }
 0x404   :  { %3017 = vrcp.f32 %v1422_v46 }
 0x408   :  { %v3014_v62 = vpop.eup %3013 }
 0x409   :  { %v1290_v44 = vmul.f32 %v3014_v62, %v3939_v38  ;;  %v3016_v10 = vpop.eup %3015  ;;  %v1428_v48 = vpop.xlane.xlu2 %1427 }
 0x40a   :  { %v3018_v39 = vpop.eup %3017  ;;  %v1437_v1 = vmul.f32 %v3016_v10, %v3930_v52 }
 0x40b   :  { %v1293_v23 = vpack.c.bf16 %v1290_v44, %v1289_v56  ;;  %v1436_v20 = vmul.f32 %v3018_v39, %v3925_v26 }
 0x40d   :  { %2599 = vmatmul.msk.bf16.vlgmr.msrb.gmra.mxu0 %vm1083_vm9, %v1293_v23  ;;  %v1440_v29 = vpack.c.bf16 %v1437_v1, %v1436_v20 }
 0x411   :  { %v1588_v50 = vpop.permute.xlu2 %1587 }
 0x412   :  { %v1445_v24 = vpop.permute.xlu1 %1444 }
 0x413   :  { %1460 = vmatpush.bf16.msrb.mxu2 %v1445_v24 }
 0x417   :  { %1461 = vmatpush.bf16.msrb.mxu2 %v1443_v51 }
 0x41a   :  { %2603 = vmatmul.msk.bf16.vlgmr.msrb.gmra.mxu2 %vm1083_vm9, %v1440_v29 }
 0x41e   :  { %v1281_v5 = vpop.xlane.xlu0 %1280 }
 0x41f   :  { %3019 = vrcp.f32 %v1281_v5 }
 0x425   :  { %v3020_v40 = vpop.eup %3019 }
 0x426   :  { %v1284_v38 = vpop.xlane.xlu0 %1283  ;;  %v1291_v43 = vmul.f32 %v3020_v40, %v3953_v58  ;;  %v2862_v40 = vld [vmem:[#allocation18 + $0x38] sm:$0xff] }
 0x427   :  { %3021 = vrcp.f32 %v1284_v38  ;;  %1713 = vmatpush.bf16.msrb.mxu1 %v2862_v40 }
 0x42d   :  { %v3022_v41 = vpop.eup %3021 }
 0x42e   :  { %v1292_v55 = vmul.f32 %v3022_v41, %v3959_v8  ;;  %v1567_v52 = vpop.xlane.xlu0 %1566 }
 0x42f   :  { %3023 = vrcp.f32 %v1567_v52  ;;  %v2859_v52 = vld [vmem:[#allocation18 + $0x20] sm:$0xff] }
 0x430   :  { %v1294_v45 = vpack.c.bf16 %v1292_v55, %v1291_v43  ;;  %v2861_v43 = vld [vmem:[#allocation18 + $0x30] sm:$0xff] }
 0x431   :  { %1714 = vmatpush.bf16.msrb.mxu1 %v2861_v43 }
 0x432   :  { %2600 = vmatmul.msk.bf16.gmra.mxu0 %vm1083_vm9, %v1294_v45  ;;  %v2860_v45 = vld [vmem:[#allocation18 + $0x28] sm:$0xff] }
 0x435   :  { %v3024_v57 = vpop.eup %3023  ;;  %1715 = vmatpush.bf16.msrb.mxu1 %v2860_v45 }
 0x436   :  { %v1581_v60 = vmul.f32 %v3024_v57, %v3964_v18 }
 0x439   :  { %1716 = vmatpush.bf16.msrb.mxu1 %v2859_v52 }
 0x441   :  { %v1590_v26 = vpop.permute.xlu0 %1589 }
 0x442   :  { %v1570_v2 = vpop.xlane.xlu1 %1569  ;;  %1605 = vmatpush.bf16.msra.mxu0 %v1590_v26  ;;  %v2857_v26 = vld [vmem:[#allocation18 + $0x10] sm:$0xff] }
 0x443   :  { %3025 = vrcp.f32 %v1570_v2  ;;  %v2856_v2 = vld [vmem:[#allocation18 + $0x8] sm:$0xff] }
 0x446   :  { %1606 = vmatpush.bf16.msra.mxu0 %v1588_v50  ;;  %v2855_v50 = vld [vmem:[#allocation18] sm:$0xff] }
 0x449   :  { %v3026_v22 = vpop.eup %3025  ;;  %v1184_v13 = vpop.f32.mrf.mxu2 }
 0x44a   :  { %v1582_v58 = vmul.f32 %v3026_v22, %v3973_v59  ;;  %v1573_v8 = vpop.xlane.xlu1 %1572  ;;  %1194 = vst.msk [vmem:[#allocation2] sm:$0xff] %vm1083_vm9, %v1184_v13 }
 0x44b   :  { %3027 = vrcp.f32 %v1573_v8 }
 0x44c   :  { %v1585_v3 = vpack.c.bf16 %v1582_v58, %v1581_v60 }
 0x44e   :  { %2607 = vmatmul.msk.bf16.vlgmr.msra.gmra.mxu0 %vm1083_vm9, %v1585_v3 }
 0x451   :  { %v1186_v61 = vpop.f32.mrf.mxu2  ;;  %v3028_v42 = vpop.eup %3027 }
 0x452   :  { %v1576_v47 = vpop.xlane.xlu1 %1575  ;;  %1195 = vst.msk [vmem:[#allocation2 + $0x8] sm:$0xff] %vm1083_vm9, %v1186_v61  ;;  %v1583_v18 = vmul.f32 %v3028_v42, %v3982_v63 }
 0x453   :  { %3029 = vrcp.f32 %v1576_v47 }
 0x454   :  { %3031 = vrcp.f32 %v1428_v48  ;;  %v2858_v48 = vld [vmem:[#allocation18 + $0x18] sm:$0xff] }
 0x455   :  { %1717 = vmatpush.bf16.msrb.mxu1 %v2858_v48 }
 0x459   :  { %v3030_v21 = vpop.eup %3029  ;;  %v1189_v51 = vpop.f32.mrf.mxu2  ;;  %1718 = vmatpush.bf16.msrb.mxu1 %v2857_v26 }
 0x45a   :  { %v1584_v59 = vmul.f32 %v3030_v21, %v3987_v6  ;;  %1196 = vst.msk [vmem:[#allocation2 + $0x10] sm:$0xff] %vm1083_vm9, %v1189_v51  ;;  %v3032_v4 = vpop.eup %3031 }
 0x45b   :  { %v1438_v62 = vmul.f32 %v3032_v4, %v3943_v49 }
 0x45c   :  { %v1586_v14 = vpack.c.bf16 %v1584_v59, %v1583_v18 }
 0x45d   :  { %1719 = vmatpush.bf16.msrb.mxu1 %v2856_v2 }
 0x45e   :  { %2608 = vmatmul.msk.bf16.gmra.mxu0 %vm1083_vm9, %v1586_v14  ;;  %v2933_v14 = vld [vmem:[#allocation20] ss:$0 sm:$0xff] }
 0x461   :  { %v1191_v9 = vpop.f32.mrf.mxu2  ;;  %1720 = vmatpush.bf16.msrb.mxu1 %v2855_v50 }
 0x462   :  { %1197 = vst.msk [vmem:[#allocation2 + $0x18] sm:$0xff] %vm1083_vm9, %v1191_v9 }
 0x46c   :  { %v1431_v54 = vpop.xlane.xlu0 %1430 }
 0x46d   :  { %3033 = vrcp.f32 %v1431_v54  ;;  %v653_v54 = vadd.f32 %v3746_v25, %v3749_v32 }
 0x473   :  { %v3034_v19 = vpop.eup %3033 }
 0x474   :  { %v1439_v56 = vmul.f32 %v3034_v19, %v3993_v7 }
 0x476   :  { %v1441_v63 = vpack.c.bf16 %v1439_v56, %v1438_v62  ;;  %v3051_v62 = vld [vmem:[#allocation3] sm:$0xff] }
 0x478   :  { %2604 = vmatmul.msk.bf16.gmra.mxu2 %vm1083_vm9, %v1441_v63 }
 0x48a   :  { %v1318_v6 = vpop.f32.mrf.mxu0 }
 0x48b   :  { %1332 = vrot.lane.b32.xlu2 %v1318_v6, %s3458_s7 }
 0x492   :  { %v1320_v44 = vpop.f32.mrf.mxu0 }
 0x493   :  { %1334 = vrot.lane.b32.xlu1 %v1320_v44, %s3458_s7  ;;  %v658_v44 = vadd.f32 %v3754_v0, %v3749_v32 }
 0x49d   :  { %v1463_v46 = vpop.f32.mrf.mxu2 }
 0x49e   :  { %1477 = vrot.lane.b32.xlu2 %v1463_v46, %s3443_s0 }
 0x4a5   :  { %v1465_v23 = vpop.f32.mrf.mxu2 }
 0x4a6   :  { %1479 = vrot.lane.b32.xlu2 %v1465_v23, %s3443_s0 }
 0x4af   :  { %v1323_v10 = vpop.f32.mrf.mxu0 }
 0x4b0   :  { %1336 = vrot.lane.b32.xlu1 %v1323_v10, %s3458_s7 }
 0x4b7   :  { %v1325_v49 = vpop.f32.mrf.mxu0 }
 0x4cb   :  { %v1608_v7 = vpop.f32.mrf.mxu0 }
 0x4cc   :  { %1622 = vrot.lane.b32.xlu0 %v1608_v7, %s3457_s10 }
 0x4d3   :  { %v1610_v24 = vpop.f32.mrf.mxu0 }
 0x4d4   :  { %1624 = vrot.lane.b32.xlu2 %v1610_v24, %s3457_s10 }
 0x4db   :  { %v1613_v39 = vpop.f32.mrf.mxu0 }
 0x4dc   :  { %1338 = vrot.lane.b32.xlu2 %v1325_v49, %s3458_s7  ;;  %v3052_v49 = vld [vmem:[#allocation3 + $0x10] sm:$0xff] }
 0x4e3   :  { %v1615_v5 = vpop.f32.mrf.mxu0 }
 0x4e4   :  { %1626 = vrot.lane.b32.xlu2 %v1613_v39, %s3457_s10 }
 0x4e5   :  { %v1333_v1 = vpop.permute.xlu2 %1332 }
 0x4e6   :  { %1345 = vst.msk [vmem:[#allocation2] sm:$0xff] %vm1344_vm10, %v1333_v1 }
 0x4f8   :  { %v1478_v20 = vpop.permute.xlu2 %1477 }
 0x4f9   :  { %1490 = vst.msk [vmem:[#allocation2] sm:$0xff] %vm1489_vm11, %v1478_v20  ;;  %v3053_v20 = vld [vmem:[#allocation3 + $0x18] sm:$0xff] }
 0x4fb   :  { %v1468_v29 = vpop.f32.mrf.mxu2 }
 0x4fc   :  { %1481 = vrot.lane.b32.xlu1 %v1468_v29, %s3443_s0 }
 0x500   :  { %v1480_v55 = vpop.permute.xlu2 %1479 }
 0x503   :  { %v1470_v38 = vpop.f32.mrf.mxu2 }
 0x504   :  { %1628 = vrot.lane.b32.xlu1 %v1615_v5, %s3457_s10  ;;  %1483 = vrot.lane.b32.xlu0 %v1470_v38, %s3443_s0  ;;  %v3054_v5 = vld [vmem:[#allocation3 + $0x8] sm:$0xff] }
 0x505   :  { %v1335_v41 = vpop.permute.xlu1 %1334 }
 0x506   :  { %1346 = vst.msk [vmem:[#allocation2 + $0x8] sm:$0xff] %vm1344_vm10, %v1335_v41 }
 0x507   :  { %1491 = vst.msk [vmem:[#allocation2 + $0x8] sm:$0xff] %vm1489_vm11, %v1480_v55 }
 0x522   :  { %v1337_v57 = vpop.permute.xlu1 %1336 }
 0x523   :  { %1347 = vst.msk [vmem:[#allocation2 + $0x10] sm:$0xff] %vm1344_vm10, %v1337_v57 }
 0x52e   :  { %v1625_v22 = vpop.permute.xlu2 %1624 }
 0x52f   :  { %1636 = vst.msk [vmem:[#allocation2 + $0x8] sm:$0xff] %vm1634_vm12, %v1625_v22 }
 0x536   :  { %v1339_v60 = vpop.permute.xlu2 %1338  ;;  %v1640_v8 = vld [vmem:[#allocation2 + $0x8] sm:$0xff] }
 0x537   :  { %1348 = vst.msk [vmem:[#allocation2 + $0x18] sm:$0xff] %vm1344_vm10, %v1339_v60 }
 0x53e   :  { %v1623_v58 = vpop.permute.xlu0 %1622  ;;  %v1627_v47 = vpop.permute.xlu2 %1626 }
 0x53f   :  { %1635 = vst.msk [vmem:[#allocation2] sm:$0xff] %vm1634_vm12, %v1623_v58 }
 0x546   :  { %v1639_v13 = vld [vmem:[#allocation2] sm:$0xff] }
 0x547   :  { %v1643_v3 = vpack.c.bf16 %v1640_v8, %v1639_v13 }
 0x549   :  { %1721 = vmatmul.bf16.vlgmr.msrb.gmra.mxu1 %v1643_v3 }
 0x56e   :  { %v1482_v61 = vpop.permute.xlu1 %1481 }
 0x56f   :  { %1492 = vst.msk [vmem:[#allocation2 + $0x10] sm:$0xff] %vm1489_vm11, %v1482_v61 }
 0x570   :  { %1637 = vst.msk [vmem:[#allocation2 + $0x10] sm:$0xff] %vm1634_vm12, %v1627_v47 }
 0x576   :  { %v1629_v42 = vpop.permute.xlu1 %1628  ;;  %v1484_v21 = vpop.permute.xlu0 %1483 }
 0x577   :  { %1493 = vst.msk [vmem:[#allocation2 + $0x18] sm:$0xff] %vm1489_vm11, %v1484_v21  ;;  %v1641_v51 = vld [vmem:[#allocation2 + $0x10] sm:$0xff] }
 0x578   :  { %1638 = vst.msk [vmem:[#allocation2 + $0x18] sm:$0xff] %vm1634_vm12, %v1629_v42 }
 0x57f   :  { %v1642_v18 = vld [vmem:[#allocation2 + $0x18] sm:$0xff] }
 0x580   :  { %v1644_v59 = vpack.c.bf16 %v1642_v18, %v1641_v51 }
 0x582   :  { %1726 = vmatmul.bf16.gmra.mxu1 %v1644_v59 }
 0x5c6   :  { %v1722_v9 = vpop.f32.mrf.mxu1 }
 0x5c7   :  { %v1723_v4 = vadd.f32 %v2933_v14, %v1722_v9 }
 0x5c9   :  { %v1732_v19 = vmul.f32 %v1723_v4, %v653_v54  ;;  %v4089_v54 = vld [vmem:[#allocation12] ss:$0 sm:$0xff] }
 0x5cb   :  { %v4045_v56 = vadd.f32 %v3051_v62, %v1732_v19  ;;  %v4093_v62 = vld [vmem:[#allocation14] ss:$0 sm:$0xff] }
 0x5cd   :  { %1742 = vadd.xlane.f32.xlu1 %v4045_v56 }
 0x5ce   :  { %v1724_v63 = vpop.f32.mrf.mxu1 }
 0x5cf   :  { %v1725_v10 = vadd.f32 %v2933_v14, %v1724_v63 }
 0x5d1   :  { %v1733_v24 = vmul.f32 %v1725_v10, %v3752_v11 }
 0x5d3   :  { %v4057_v38 = vadd.f32 %v3054_v5, %v1733_v24 }
 0x5ff   :  { %v1727_v6 = vpop.f32.mrf.mxu1 }
 0x600   :  { %v1728_v46 = vadd.f32 %v2933_v14, %v1727_v6 }
 0x602   :  { %v1734_v23 = vmul.f32 %v1728_v46, %v658_v44 }
 0x604   :  { %v4050_v7 = vadd.f32 %v3052_v49, %v1734_v23 }
 0x606   :  { %1746 = vadd.xlane.f32.xlu0 %v4050_v7 }
 0x607   :  { %v1729_v25 = vpop.f32.mrf.mxu1 }
 0x608   :  { %v1730_v39 = vadd.f32 %v2933_v14, %v1729_v25  ;;  %v4084_v14 = vld [vmem:[%s4171_s8] sm:$0x3f] }
 0x609   :  { %v4087_v9 = vperm.slane %v4084_v14, 4  ;;  %v4096_v6 = vperm.slane %v4084_v14, 3 }
 0x60a   :  { %v1735_v1 = vmul.f32 %v1730_v39, %v3761_v30 }
 0x60b   :  { %v691_v19 = vadd.f32 %v3758_v28, %v4087_v9  ;;  %v672_v10 = vadd.f32 %v3763_v53, %v4096_v6 }
 0x60c   :  { %v4055_v29 = vadd.f32 %v3053_v20, %v1735_v1 }
 0x60d   :  { %v1848_v46 = vadd.f32 1.0, %v691_v19 }
 0x60e   :  { %1748 = vadd.xlane.f32.xlu2 %v4055_v29  ;;  %1744 = vadd.xlane.f32.xlu0 %v4057_v38 }
 0x640   :  { %v1743_v32 = vpop.xlane.xlu1 %1742 }
 0x641   :  { %v1750_v0 = vmul.f32 %v1743_v32, %v3649_v12 }
 0x643   :  { %v1754_v40 = vsub.f32 %v4045_v56, %v1750_v0 }
 0x645   :  { %v1758_v41 = vmul.f32 %v1754_v40, %v1754_v40 }
 0x647   :  { %1762 = vadd.xlane.f32.xlu0 %v1758_v41 }
 0x679   :  { %v1747_v11 = vpop.xlane.xlu0 %1746 }
 0x67a   :  { %v1752_v30 = vmul.f32 %v1747_v11, %v3649_v12 }
 0x67c   :  { %v4065_v43 = vsub.f32 %v4050_v7, %v1752_v30 }
 0x67e   :  { %v1760_v55 = vmul.f32 %v4065_v43, %v4065_v43 }
 0x680   :  { %1766 = vadd.xlane.f32.xlu2 %v1760_v55 }
 0x681   :  { %v1749_v45 = vpop.xlane.xlu2 %1748  ;;  %v1745_v52 = vpop.xlane.xlu0 %1744 }
 0x682   :  { %v1753_v48 = vmul.f32 %v1749_v45, %v3649_v12  ;;  %v1751_v26 = vmul.f32 %v1745_v52, %v3649_v12 }
 0x684   :  { %v4072_v2 = vsub.f32 %v4055_v29, %v1753_v48  ;;  %v4075_v50 = vsub.f32 %v4057_v38, %v1751_v26 }
 0x686   :  { %v1761_v57 = vmul.f32 %v4072_v2, %v4072_v2  ;;  %v1759_v22 = vmul.f32 %v4075_v50, %v4075_v50 }
 0x688   :  { %1768 = vadd.xlane.f32.xlu1 %v1761_v57  ;;  %1764 = vadd.xlane.f32.xlu2 %v1759_v22 }
 0x6ba   :  { %v1763_v60 = vpop.xlane.xlu0 %1762 }
 0x6bb   :  { %v1770_v58 = vmul.f32 0.007874016, %v1763_v60 }
 0x6bd   :  { %3035 = vrsqrt.f32 %v1770_v58  ;;  %vm1781_vm13 = vcmp.eq.f32.partialorder %v1770_v58, inf  ;;  %v1784_v21 = vand.u32 2147483648, %v1770_v58  ;;  %vm1783_vm14 = vcmp.eq.f32.partialorder %v1770_v58, 0.0 }
 0x6c3   :  { %v3036_v13 = vpop.eup %3035 }
 0x6c4   :  { %v1775_v8 = vmul.f32 %v3036_v13, %v1770_v58 }
 0x6c6   :  { %v1776_v12 = vmul.f32 %v3036_v13, %v1775_v8 }
 0x6c8   :  { %v1777_v3 = vmul.f32 0.5, %v1776_v12 }
 0x6ca   :  { %v1778_v61 = vsub.f32 1.5, %v1777_v3 }
 0x6cc   :  { %v1779_v47 = vmul.f32 %v3036_v13, %v1778_v61 }
 0x6ce   :  { %v1780_v42 = vmul.f32 %v1779_v47, %v1770_v58 }
 0x6d0   :  { %v1782_v51 = vsel %vm1781_vm13, %v1770_v58, %v1780_v42 }
 0x6d1   :  { %v1785_v18 = vsel %vm1783_vm14, %v1784_v21, %v1782_v51 }
 0x6d2   :  { %v1822_v59 = vadd.f32 1e-06, %v1785_v18 }
 0x6d4   :  { %3037 = vrcp.f32 %v1822_v59 }
 0x6da   :  { %v3038_v4 = vpop.eup %3037 }
 0x6db   :  { %v1830_v63 = vmul.f32 %v3038_v4, %v1754_v40 }
 0x6dd   :  { %v1837_v44 = vmul.f32 %v4089_v54, %v1830_v63 }
 0x6df   :  { %v1844_v23 = vadd.f32 %v4093_v62, %v1837_v44 }
 0x6e1   :  { %v1852_v49 = vmul.f32 %v1848_v46, %v1844_v23 }
 0x6e3   :  { %v4102_v25 = vadd.f32 %v1852_v49, %v672_v10  ;;  %v696_v10 = vadd.f32 %v3773_v35, %v4087_v9 }
 0x6f3   :  { %v1767_v24 = vpop.xlane.xlu2 %1766 }
 0x6f4   :  { %v1772_v39 = vmul.f32 0.007874016, %v1767_v24 }
 0x6f6   :  { %3039 = vrsqrt.f32 %v1772_v39  ;;  %vm1805_vm15 = vcmp.eq.f32.partialorder %v1772_v39, inf  ;;  %v1808_v57 = vand.u32 2147483648, %v1772_v39  ;;  %vm1807_vm0 = vcmp.eq.f32.partialorder %v1772_v39, 0.0 }
 0x6fb   :  { %v1769_v28 = vpop.xlane.xlu1 %1768  ;;  %v1765_v1 = vpop.xlane.xlu2 %1764 }
 0x6fc   :  { %v3040_v20 = vpop.eup %3039  ;;  %v1773_v5 = vmul.f32 0.007874016, %v1769_v28  ;;  %v1771_v32 = vmul.f32 0.007874016, %v1765_v1  ;;  %v1850_v28 = vadd.f32 1.0, %v696_v10 }
 0x6fd   :  { %v1799_v0 = vmul.f32 %v3040_v20, %v1772_v39  ;;  %v2677_v10 = vld [vmem:[#allocation23 + $0x30] sm:$0xf] }
 0x6fe   :  { %3041 = vrsqrt.f32 %v1773_v5  ;;  %vm1817_vm1 = vcmp.eq.f32.partialorder %v1773_v5, inf  ;;  %v1820_v51 = vand.u32 2147483648, %v1773_v5  ;;  %vm1819_vm2 = vcmp.eq.f32.partialorder %v1773_v5, 0.0 }
 0x6ff   :  { %v1800_v40 = vmul.f32 %v3040_v20, %v1799_v0  ;;  %3043 = vrsqrt.f32 %v1771_v32  ;;  %vm1793_vm3 = vcmp.eq.f32.partialorder %v1771_v32, inf  ;;  %v1796_v4 = vand.u32 2147483648, %v1771_v32 }
 0x700   :  { %vm1795_vm4 = vcmp.eq.f32.partialorder %v1771_v32, 0.0 }
 0x701   :  { %v1801_v41 = vmul.f32 0.5, %v1800_v40 }
 0x703   :  { %v1802_v11 = vsub.f32 1.5, %v1801_v41  ;;  %v693_v41 = vadd.f32 %v3767_v31, %v4087_v9 }
 0x704   :  { %v3042_v30 = vpop.eup %3041 }
 0x705   :  { %v3044_v55 = vpop.eup %3043  ;;  %v1803_v53 = vmul.f32 %v3040_v20, %v1802_v11  ;;  %v1811_v45 = vmul.f32 %v3042_v30, %v1773_v5  ;;  %v677_v20 = vadd.f32 %v3775_v15, %v4096_v6  ;;  %v2709_v15 = vld [vmem:[#allocation23 + $0x70] sm:$0xf] }
 0x706   :  { %v1787_v52 = vmul.f32 %v3044_v55, %v1771_v32 }
 0x707   :  { %v1804_v48 = vmul.f32 %v1803_v53, %v1772_v39  ;;  %v1812_v26 = vmul.f32 %v3042_v30, %v1811_v45  ;;  %v2880_v45 = vld [vmem:[#allocation23 + $0x74] sm:$0xf0] }
 0x708   :  { %v1788_v22 = vmul.f32 %v3044_v55, %v1787_v52  ;;  %v2879_v52 = vld [vmem:[#allocation23 + $0x74] sm:$0xf] }
 0x709   :  { %v1806_v60 = vsel %vm1805_vm15, %v1772_v39, %v1804_v48  ;;  %v1813_v58 = vmul.f32 0.5, %v1812_v26  ;;  %v2710_v48 = vor.u32 %v2880_v45, %v2709_v15  ;;  %v2711_v26 = vld [vmem:[#allocation23 + $0x78] sm:$0xf0]  ;;  %v2653_v15 = vld [vmem:[#allocation23] sm:$0xf] }
 0x70a   :  { %v1789_v13 = vmul.f32 0.5, %v1788_v22  ;;  %v1809_v8 = vsel %vm1807_vm0, %v1808_v57, %v1806_v60  ;;  %v2701_v57 = vld [vmem:[#allocation23 + $0x60] sm:$0xf]  ;;  %v1849_v22 = vadd.f32 1.0, %v693_v41  ;;  %v2714_v31 = vor.u32 %v2879_v52, %v2711_v26  ;;  %v2866_v45 = vld [vmem:[#allocation23 + $0x4] sm:$0xf0] }
 0x70b   :  { %v1814_v12 = vsub.f32 1.5, %v1813_v58  ;;  %v1824_v3 = vadd.f32 1e-06, %v1809_v8  ;;  %v679_v58 = vadd.f32 %v3781_v16, %v4096_v6  ;;  %2005 = vmatpush.bf16.msra.mxu3 %v2710_v48  ;;  %v674_v8 = vadd.f32 %v3769_v33, %v4096_v6  ;;  %v2873_v33 = vld [vmem:[#allocation23 + $0x44] sm:$0xf] }
 0x70c   :  { %v1790_v61 = vsub.f32 1.5, %v1789_v13  ;;  %2024 = vmatpush.bf16.msrb.mxu0 %v2714_v31  ;;  %v2687_v6 = vld [vmem:[#allocation23 + $0x48] sm:$0xf0]  ;;  %v2865_v52 = vld [vmem:[#allocation23 + $0x4] sm:$0xf] }
 0x70d   :  { %v1815_v47 = vmul.f32 %v3042_v30, %v1814_v12  ;;  %3045 = vrcp.f32 %v1824_v3  ;;  %v2655_v48 = vld [vmem:[#allocation23 + $0x8] sm:$0xf0] }
 0x70e   :  { %v1791_v42 = vmul.f32 %v3044_v55, %v1790_v61  ;;  %v2693_v61 = vld [vmem:[#allocation23 + $0x50] sm:$0xf]  ;;  %v2658_v26 = vor.u32 %v2865_v52, %v2655_v48  ;;  %v2882_v52 = vld [vmem:[#allocation24 + $0x8] sm:$0xff]  ;;  %v2889_v48 = vld [vmem:[#allocation24 + $0x40] sm:$0xff] }
 0x70f   :  { %v1816_v21 = vmul.f32 %v1815_v47, %v1773_v5  ;;  %v2876_v47 = vld [vmem:[#allocation23 + $0x54] sm:$0xf0] }
 0x710   :  { %v1792_v18 = vmul.f32 %v1791_v42, %v1771_v32 }
 0x711   :  { %v1818_v59 = vsel %vm1817_vm1, %v1773_v5, %v1816_v21  ;;  %v698_v5 = vadd.f32 %v3779_v37, %v4087_v9  ;;  %v2877_v9 = vld [vmem:[#allocation23 + $0x64] sm:$0xf]  ;;  %v2875_v21 = vld [vmem:[#allocation23 + $0x54] sm:$0xf] }
 0x712   :  { %v1821_v19 = vsel %vm1819_vm2, %v1820_v51, %v1818_v59  ;;  %v1794_v63 = vsel %vm1793_vm3, %v1771_v32, %v1792_v18  ;;  %v2694_v59 = vor.u32 %v2876_v47, %v2693_v61 }
 0x713   :  { %v3046_v44 = vpop.eup %3045  ;;  %v1825_v46 = vadd.f32 1e-06, %v1821_v19  ;;  %v1797_v23 = vsel %vm1795_vm4, %v1796_v4, %v1794_v63  ;;  %v1851_v30 = vadd.f32 1.0, %v698_v5  ;;  %v2685_v19 = vld [vmem:[#allocation23 + $0x40] sm:$0xf] }
 0x714   :  { %v1832_v49 = vmul.f32 %v3046_v44, %v4065_v43  ;;  %v1823_v24 = vadd.f32 1e-06, %v1797_v23  ;;  %v2874_v63 = vld [vmem:[#allocation23 + $0x44] sm:$0xf0]  ;;  %v2690_v23 = vor.u32 %v2873_v33, %v2687_v6  ;;  %v2896_v6 = vld [vmem:[#allocation24 + $0x78] sm:$0xff] }
 0x715   :  { %3047 = vrcp.f32 %v1825_v46  ;;  %v2686_v44 = vor.u32 %v2874_v63, %v2685_v19  ;;  %v4126_v46 = vld [vmem:[#allocation21] sm:$0xff]  ;;  %v2870_v5 = vld [vmem:[#allocation23 + $0x24] sm:$0xf0] }
 0x716   :  { %v1839_v39 = vmul.f32 %v4089_v54, %v1832_v49  ;;  %3049 = vrcp.f32 %v1823_v24  ;;  %v2872_v49 = vld [vmem:[#allocation23 + $0x34] sm:$0xf0]  ;;  %v2871_v24 = vld [vmem:[#allocation23 + $0x34] sm:$0xf] }
 0x718   :  { %v1846_v1 = vadd.f32 %v4093_v62, %v1839_v39  ;;  %v2679_v39 = vld [vmem:[#allocation23 + $0x38] sm:$0xf0] }
 0x71a   :  { %v1854_v32 = vmul.f32 %v1850_v28, %v1846_v1  ;;  %v2682_v28 = vor.u32 %v2871_v24, %v2679_v39  ;;  %v4130_v1 = vld [vmem:[#allocation21 + $0x8] sm:$0xff]  ;;  %v2895_v39 = vld [vmem:[#allocation24 + $0x70] sm:$0xff] }
 0x71b   :  { %v3048_v0 = vpop.eup %3047 }
 0x71c   :  { %v3050_v40 = vpop.eup %3049  ;;  %v1833_v35 = vmul.f32 %v3048_v0, %v4072_v2  ;;  %v1858_v43 = vadd.f32 %v1854_v32, %v677_v20  ;;  %v2878_v2 = vld [vmem:[#allocation23 + $0x64] sm:$0xf0]  ;;  %v2669_v20 = vld [vmem:[#allocation23 + $0x20] sm:$0xf]  ;;  %v2869_v32 = vld [vmem:[#allocation23 + $0x24] sm:$0xf] }
 0x71d   :  { %v1831_v11 = vmul.f32 %v3050_v40, %v4075_v50  ;;  %v2703_v50 = vld [vmem:[#allocation23 + $0x68] sm:$0xf0]  ;;  %v2670_v0 = vor.u32 %v2870_v5, %v2669_v20 }
 0x71e   :  { %v1840_v55 = vmul.f32 %v4089_v54, %v1833_v35  ;;  %v2706_v3 = vor.u32 %v2877_v9, %v2703_v50  ;;  %v2671_v40 = vld [vmem:[#allocation23 + $0x28] sm:$0xf0]  ;;  %v2661_v35 = vld [vmem:[#allocation23 + $0x10] sm:$0xf] }
 0x71f   :  { %v1838_v53 = vmul.f32 %v4089_v54, %v1831_v11  ;;  %v2702_v54 = vor.u32 %v2878_v2, %v2701_v57  ;;  %v2674_v41 = vor.u32 %v2869_v32, %v2671_v40  ;;  %v2867_v11 = vld [vmem:[#allocation23 + $0x14] sm:$0xf]  ;;  %v2886_v32 = vld [vmem:[#allocation24 + $0x28] sm:$0xff] }
 0x720   :  { %v1847_v37 = vadd.f32 %v4093_v62, %v1840_v55  ;;  %2025 = vmatpush.bf16.msrb.mxu0 %v2706_v3 }
 0x721   :  { %v1845_v60 = vadd.f32 %v4093_v62, %v1838_v53  ;;  %v2695_v62 = vld [vmem:[#allocation23 + $0x58] sm:$0xf0]  ;;  %2006 = vmatpush.bf16.msra.mxu3 %v2702_v54 }
 0x722   :  { %v1855_v13 = vmul.f32 %v1851_v30, %v1847_v37  ;;  %v2698_v4 = vor.u32 %v2875_v21, %v2695_v62  ;;  %v2663_v30 = vld [vmem:[#allocation23 + $0x18] sm:$0xf0]  ;;  %v2654_v37 = vor.u32 %v2866_v45, %v2653_v15  ;;  %v2883_v15 = vld [vmem:[#allocation24 + $0x10] sm:$0xff] }
 0x723   :  { %v1853_v12 = vmul.f32 %v1849_v22, %v1845_v60  ;;  %v2666_v53 = vor.u32 %v2867_v11, %v2663_v30  ;;  %v2884_v30 = vld [vmem:[#allocation24 + $0x18] sm:$0xff]  ;;  %v2891_v45 = vld [vmem:[#allocation24 + $0x50] sm:$0xff] }
 0x724   :  { %v1859_v42 = vadd.f32 %v1855_v13, %v679_v58  ;;  %2026 = vmatpush.bf16.msrb.mxu0 %v2698_v4  ;;  %v2888_v4 = vld [vmem:[#allocation24 + $0x38] sm:$0xff] }
 0x725   :  { %v1857_v51 = vadd.f32 %v1853_v12, %v674_v8  ;;  %2007 = vmatpush.bf16.msra.mxu3 %v2694_v59  ;;  %v1919_v12 = vld [vmem:[%s4178_s15] sm:$0x3] }
 0x726   :  { %v1865_v18 = vpack.c.bf16 %v1859_v42, %v1858_v43  ;;  %v2868_v43 = vld [vmem:[#allocation23 + $0x14] sm:$0xf0]  ;;  %v1922_v3 = vperm.slane %v1919_v12, 1 }
 0x727   :  { %v1864_v16 = vpack.c.bf16 %v1857_v51, %v4102_v25  ;;  %v2678_v25 = vor.u32 %v2872_v49, %v2677_v10  ;;  %v2662_v55 = vor.u32 %v2868_v43, %v2661_v35  ;;  %v2894_v35 = vld [vmem:[#allocation24 + $0x68] sm:$0xff] }
 0x728   :  { %1888 = vmatpush.bf16.msra.mxu2 %v1865_v18  ;;  %2027 = vmatpush.bf16.msrb.mxu0 %v2690_v23  ;;  %v1921_v18 = vperm.slane %v1919_v12, 0  ;;  %v2887_v23 = vld [vmem:[#allocation24 + $0x30] sm:$0xff]  ;;  %v2936_v12 = vld [vmem:[%s4180_s17] ss:$0 sm:$0xff]  ;;  %s3459_s17 = smov [#allocation26]  }
 0x729   :  { %2008 = vmatpush.bf16.msra.mxu3 %v2686_v44  ;;  %s2283_s6 = sshll.u32 %s3459_s17, 4  ;;  %s2284_s6 = int_to_ptr.vmem [resolvable:$true] %s2283_s6 }
 0x72c   :  { %1889 = vmatpush.bf16.msra.mxu2 %v1864_v16  ;;  %2028 = vmatpush.bf16.msrb.mxu0 %v2682_v28 }
 0x72d   :  { %2009 = vmatpush.bf16.msra.mxu3 %v2678_v25 }
 0x72f   :  { %2649 = vmatmul.msk.bf16.vlgmr.msra.gmra.mxu2 %vm1083_vm9, %v4126_v46 }
 0x730   :  { %2029 = vmatpush.bf16.msrb.mxu0 %v2674_v41  ;;  %v2885_v41 = vld [vmem:[#allocation24 + $0x20] sm:$0xff] }
 0x731   :  { %2010 = vmatpush.bf16.msra.mxu3 %v2670_v0 }
 0x734   :  { %2030 = vmatpush.bf16.msrb.mxu0 %v2666_v53  ;;  %v2892_v53 = vld [vmem:[#allocation24 + $0x58] sm:$0xff] }
 0x735   :  { %2011 = vmatpush.bf16.msra.mxu3 %v2662_v55  ;;  %v2893_v55 = vld [vmem:[#allocation24 + $0x60] sm:$0xff] }
 0x738   :  { %2031 = vmatpush.bf16.msrb.mxu0 %v2658_v26 }
 0x739   :  { %2012 = vmatpush.bf16.msra.mxu3 %v2654_v37  ;;  %v2890_v37 = vld [vmem:[#allocation24 + $0x48] sm:$0xff] }
 0x73c   :  { %2248 = vmatpush.bf16.msra.mxu0 %v2896_v6 }
 0x73d   :  { %2229 = vmatpush.bf16.msrb.mxu3 %v2888_v4 }
 0x73f   :  { %2650 = vmatmul.msk.bf16.gmra.mxu2 %vm1083_vm9, %v4130_v1 }
 0x740   :  { %2249 = vmatpush.bf16.msra.mxu0 %v2895_v39 }
 0x741   :  { %2230 = vmatpush.bf16.msrb.mxu3 %v2887_v23 }
 0x744   :  { %2250 = vmatpush.bf16.msra.mxu0 %v2894_v35 }
 0x745   :  { %2231 = vmatpush.bf16.msrb.mxu3 %v2886_v32 }
 0x748   :  { %2251 = vmatpush.bf16.msra.mxu0 %v2893_v55 }
 0x749   :  { %2232 = vmatpush.bf16.msrb.mxu3 %v2885_v41 }
 0x74c   :  { %2252 = vmatpush.bf16.msra.mxu0 %v2892_v53 }
 0x74d   :  { %2233 = vmatpush.bf16.msrb.mxu3 %v2884_v30 }
 0x750   :  { %2253 = vmatpush.bf16.msra.mxu0 %v2891_v45 }
 0x751   :  { %2234 = vmatpush.bf16.msrb.mxu3 %v2883_v15 }
 0x754   :  { %2254 = vmatpush.bf16.msra.mxu0 %v2890_v37 }
 0x755   :  { %2235 = vmatpush.bf16.msrb.mxu3 %v2882_v52 }
 0x758   :  { %2255 = vmatpush.bf16.msra.mxu0 %v2889_v48 }
 0x7b2   :  { %v1891_v57 = vpop.f32.mrf.mxu2 }
 0x7ba   :  { %v1893_v2 = vpop.f32.mrf.mxu2 }
 0x7bb   :  { %v1901_v22 = vpack.c.bf16 %v1893_v2, %v1891_v57 }
 0x7bd   :  { %2013 = vmatmul.bf16.vlgmr.msra.gmra.mxu3 %v1901_v22  ;;  %2032 = vmatmul.bf16.vlgmr.msrb.gmra.mxu0 %v1901_v22 }
 0x7c2   :  { %v1896_v60 = vpop.f32.mrf.mxu2 }
 0x7ca   :  { %v1898_v31 = vpop.f32.mrf.mxu2 }
 0x7cb   :  { %v1902_v9 = vpack.c.bf16 %v1898_v31, %v1896_v60 }
 0x7cd   :  { %2018 = vmatmul.bf16.gmra.mxu3 %v1902_v9  ;;  %2037 = vmatmul.bf16.gmra.mxu0 %v1902_v9 }
 0x83a   :  { %v2033_v50 = vpop.f32.mrf.mxu0 }
 0x83b   :  { %v2034_v51 = vadd.f32 %v2033_v50, %v1922_v3 }
 0x83d   :  { %v2044_v10 = vmax.f32 %v2034_v51, 0.0 }
 0x840   :  { %v2014_v58 = vpop.f32.mrf.mxu3 }
 0x841   :  { %v2015_v25 = vadd.f32 %v2014_v58, %v1921_v18 }
 0x842   :  { %v2035_v13 = vpop.f32.mrf.mxu0 }
 0x843   :  { %v2036_v21 = vadd.f32 %v2035_v13, %v1922_v3  ;;  %v2043_v43 = vmax.f32 %v2015_v25, 0.0 }
 0x845   :  { %v2046_v19 = vmax.f32 %v2036_v21, 0.0 }
 0x847   :  { %v2052_v28 = vpack.c.bf16 %v2046_v19, %v2044_v10 }
 0x848   :  { %v2016_v54 = vpop.f32.mrf.mxu3 }
 0x849   :  { %v2017_v49 = vadd.f32 %v2016_v54, %v1921_v18 }
 0x84a   :  { %v2038_v8 = vpop.f32.mrf.mxu0 }
 0x84b   :  { %v2039_v47 = vadd.f32 %v2038_v8, %v1922_v3  ;;  %v2045_v0 = vmax.f32 %v2017_v49, 0.0 }
 0x84d   :  { %v2048_v59 = vmax.f32 %v2039_v47, 0.0  ;;  %v2051_v11 = vpack.c.bf16 %v2045_v0, %v2043_v43 }
 0x850   :  { %v2019_v61 = vpop.f32.mrf.mxu3 }
 0x851   :  { %v2020_v63 = vadd.f32 %v2019_v61, %v1921_v18 }
 0x852   :  { %v2040_v42 = vpop.f32.mrf.mxu0 }
 0x853   :  { %v2041_v62 = vadd.f32 %v2040_v42, %v1922_v3  ;;  %v2047_v20 = vmax.f32 %v2020_v63, 0.0  ;;  %v358_v3 = vperm.slane %v4084_v14, 5 }
 0x855   :  { %v2050_v16 = vmax.f32 %v2041_v62, 0.0  ;;  %v710_v42 = vadd.f32 %v3756_v27, %v358_v3  ;;  %v712_v4 = vadd.f32 %v3765_v17, %v358_v3  ;;  %v715_v27 = vadd.f32 %v3771_v34, %v358_v3 }
 0x856   :  { %v717_v17 = vadd.f32 %v3777_v36, %v358_v3 }
 0x857   :  { %v2054_v33 = vpack.c.bf16 %v2050_v16, %v2048_v59 }
 0x858   :  { %v2021_v44 = vpop.f32.mrf.mxu3 }
 0x859   :  { %v2022_v24 = vadd.f32 %v2021_v44, %v1921_v18  ;;  %2080 = vmatpush.bf16.msrb.mxu2 %v2054_v33 }
 0x85b   :  { %v2049_v5 = vmax.f32 %v2022_v24, 0.0 }
 0x85d   :  { %v2053_v40 = vpack.c.bf16 %v2049_v5, %v2047_v20  ;;  %2081 = vmatpush.bf16.msrb.mxu2 %v2052_v28 }
 0x85f   :  { %2061 = vmatpush.bf16.msra.mxu1 %v2053_v40 }
 0x860   :  { %2717 = vmatmul.msk.bf16.vlgmr.msrb.gmra.mxu2 %vm1083_vm9, %v4126_v46 }
 0x863   :  { %2062 = vmatpush.bf16.msra.mxu1 %v2051_v11 }
 0x866   :  { %2715 = vmatmul.msk.bf16.vlgmr.msra.gmra.mxu1 %vm1083_vm9, %v4126_v46  ;;  %v2881_v46 = vld [vmem:[#allocation24] sm:$0xff] }
 0x867   :  { %2236 = vmatpush.bf16.msrb.mxu3 %v2881_v46 }
 0x870   :  { %2718 = vmatmul.msk.bf16.gmra.mxu2 %vm1083_vm9, %v4130_v1 }
 0x876   :  { %2716 = vmatmul.msk.bf16.gmra.mxu1 %vm1083_vm9, %v4130_v1 }
 0x8e3   :  { %v2064_v26 = vpop.f32.mrf.mxu1  ;;  %v2083_v57 = vpop.f32.mrf.mxu2 }
 0x8eb   :  { %v2066_v2 = vpop.f32.mrf.mxu1  ;;  %v2085_v1 = vpop.f32.mrf.mxu2 }
 0x8ec   :  { %v2093_v22 = vpack.c.bf16 %v2066_v2, %v2064_v26  ;;  %v2094_v60 = vpack.c.bf16 %v2085_v1, %v2083_v57 }
 0x8ee   :  { %2237 = vmatmul.bf16.vlgmr.msrb.gmra.mxu3 %v2093_v22  ;;  %2256 = vmatmul.bf16.vlgmr.msra.gmra.mxu0 %v2094_v60 }
 0x8f3   :  { %v2069_v31 = vpop.f32.mrf.mxu1  ;;  %v2088_v9 = vpop.f32.mrf.mxu2 }
 0x8fb   :  { %v2071_v50 = vpop.f32.mrf.mxu1  ;;  %v2090_v58 = vpop.f32.mrf.mxu2 }
 0x8fc   :  { %v2095_v13 = vpack.c.bf16 %v2071_v50, %v2069_v31  ;;  %v2096_v54 = vpack.c.bf16 %v2090_v58, %v2088_v9 }
 0x8fe   :  { %2242 = vmatmul.bf16.gmra.mxu3 %v2095_v13  ;;  %2261 = vmatmul.bf16.gmra.mxu0 %v2096_v54 }
 0x96b   :  { %v2257_v8 = vpop.f32.mrf.mxu0 }
 0x971   :  { %v2238_v61 = vpop.f32.mrf.mxu3 }
 0x972   :  { %v2239_v47 = vadd.f32 %v2936_v12, %v2238_v61 }
 0x973   :  { %v2259_v51 = vpop.f32.mrf.mxu0 }
 0x974   :  { %v2258_v21 = vadd.f32 %v2257_v8, %v2239_v47 }
 0x976   :  { %v2267_v62 = vmul.f32 %v2258_v21, %v710_v42 }
 0x978   :  { %v2271_v18 = vadd.f32 %v2267_v62, %v4045_v56 }
 0x979   :  { %v2240_v59 = vpop.f32.mrf.mxu3 }
 0x97a   :  { %2275 = vst [vmem:[#allocation26] sm:$0xff] %v2271_v18  ;;  %v2241_v16 = vadd.f32 %v2936_v12, %v2240_v59 }
 0x97b   :  { %v2262_v14 = vpop.f32.mrf.mxu0 }
 0x97c   :  { %v2260_v19 = vadd.f32 %v2259_v51, %v2241_v16 }
 0x97e   :  { %v2268_v63 = vmul.f32 %v2260_v19, %v712_v4 }
 0x980   :  { %v2272_v33 = vadd.f32 %v2268_v63, %v4057_v38 }
 0x981   :  { %v2243_v6 = vpop.f32.mrf.mxu3 }
 0x982   :  { %2276 = vst [vmem:[#allocation26 + $0x8] sm:$0xff] %v2272_v33  ;;  %v2244_v44 = vadd.f32 %v2936_v12, %v2243_v6 }
 0x983   :  { %v2264_v39 = vpop.f32.mrf.mxu0 }
 0x984   :  { %v2263_v23 = vadd.f32 %v2262_v14, %v2244_v44 }
 0x986   :  { %v2269_v10 = vmul.f32 %v2263_v23, %v715_v27 }
 0x988   :  { %v2273_v49 = vadd.f32 %v2269_v10, %v4050_v7 }
 0x989   :  { %v2245_v56 = vpop.f32.mrf.mxu3 }
 0x98a   :  { %2277 = vst [vmem:[#allocation26 + $0x10] sm:$0xff] %v2273_v49  ;;  %v2246_v24 = vadd.f32 %v2936_v12, %v2245_v56 }
 0x98c   :  { %v2265_v25 = vadd.f32 %v2264_v39, %v2246_v24 }
 0x98e   :  { %v2270_v38 = vmul.f32 %v2265_v25, %v717_v17 }
 0x990   :  { %v2274_v34 = vadd.f32 %v2270_v38, %v4055_v29 }
 0x992   :  { %2278 = vst [vmem:[#allocation26 + $0x18] sm:$0xff] %v2274_v34 }
 0x993   :  { %2291 = dma.vmem_to_hbm [thread:$0]  %s2284_s6, 512, %s2286_s30, [#allocation5], %s3435_s22, %s3435_s22, %s3436_s2  }
 0x994   :  { %3432 = dma.done.wait [#allocation5], 512  }
 0x995   :  { %3433 = vsyncadd [#allocation5], 4294966784 }
 0x996   :  { %2296 = vsyncpa [#allocation4], 1 }
 0x997   :  { %2297 = vsyncpa [#allocation7], 1 }
 0x998   :  { %2298 = vsyncpa [#allocation10], 1 }
 0x999   :  { %2299 = vsyncpa [#allocation13], 1 }
 0x99a   :  { %2300 = vsyncpa [#allocation16], 1 }
 0x99b   :  { %2301 = vsyncpa [#allocation19], 1 }
 0x99c   :  { %2302 = vsyncpa [#allocation22], 1 }
 0x99d   :  { %2303 = vsyncpa [#allocation25], 1 }
 0x99e   :  { %2304 = vsyncpa [#allocation5], 1 }

</bundles_post_ra>
